<compile_context>
chip_gen: v7x
topology: tpu7x:2x2x1
jax: 0.10.0
libtpu: 0.0.40
codegen_flags: <defaults>
</compile_context>

<pallas_src>
import functools

import jax
import jax.numpy as jnp
from jax.experimental import pallas as pl
from jax.experimental.pallas import tpu as pltpu

LANE = 128
SUBLANE = 8


def _round_up(x, m):
    return ((x + m - 1) // m) * m


def _pad_to(x, shape):
    pads = [(0, t - s) for s, t in zip(x.shape, shape)]
    return jnp.pad(x, pads)


def _full(shape):
    # Full-array block (no grid) -> whole tensor resident in VMEM.
    return pl.BlockSpec(shape, lambda: (0,) * len(shape))


# ---------------------------------------------------------------------------
# Fused Pallas kernel: all GCNConv+BN+ReLU layers + mean-pool + Linear
# ---------------------------------------------------------------------------
def _gcn_fused_kernel(a_ref, x_ref, w_ref, b_ref, gamma_ref, beta_ref,
                      p_ref, lw_ref, lb_ref, o_ref, *, n_real):
    """Shapes (all padded):
      a_ref:     (Np, Np)   bf16  normalized adjacency D^-1/2 (A+I) D^-1/2
      x_ref:     (Np, D)    bf16  node features
      w_ref:     (L, D, D)  bf16  stacked GCNConv weights
      b_ref:     (L, 1, D)  f32   stacked GCNConv biases
      gamma_ref: (L, 1, D)  f32   BatchNorm gamma
      beta_ref:  (L, 1, D)  f32   BatchNorm beta
      p_ref:     (Gp, Np)   f32   mean-pool matrix (row g = 1/|graph g| on its nodes)
      lw_ref:    (D, Cp)    f32   classifier weight
      lb_ref:    (1, Cp)    f32   classifier bias
      o_ref:     (Gp, Cp)   f32   logits (lane-dense store)
    """
    n_pad = a_ref.shape[0]
    num_layers = w_ref.shape[0]

    # Mask of real node rows (padded node rows must not pollute BN statistics).
    row_mask = (jax.lax.broadcasted_iota(jnp.int32, (n_pad, 1), 0)
                < n_real).astype(jnp.float32)
    inv_n = jnp.float32(1.0 / n_real)

    a = a_ref[...]                       # bf16 adjacency, resident for all layers
    h_bf16 = x_ref[...]                  # bf16 current activation (MXU input)
    h_f32 = x_ref[...].astype(jnp.float32)

    for l in range(num_layers):          # unrolled: L is small and static
        # GCNConv: A_hat @ (H @ W) + b   (bf16 MXU inputs, f32 accumulation)
        xw = jnp.dot(h_bf16, w_ref[l], preferred_element_type=jnp.float32)
        ah = jnp.dot(a, xw.astype(jnp.bfloat16),
                     preferred_element_type=jnp.float32)
        h = (ah + b_ref[l]) * row_mask   # zero padded node rows

        # BatchNorm1d (training-mode batch stats), one-pass: var = E[h^2] - E[h]^2
        mean = jnp.sum(h, axis=0, keepdims=True) * inv_n
        mean_sq = jnp.sum(h * h, axis=0, keepdims=True) * inv_n
        var = jnp.maximum(mean_sq - mean * mean, 0.0)
        hn = (h - mean) * jax.lax.rsqrt(var + 1e-5)
        hn = hn * gamma_ref[l] + beta_ref[l]

        # ReLU; re-mask so padded rows stay exactly zero for the next layer's stats.
        h_f32 = jnp.maximum(hn, 0.0) * row_mask
        h_bf16 = h_f32.astype(jnp.bfloat16)

    # global_mean_pool (pool matrix matmul) fused with the final Linear, in f32.
    pooled = jnp.dot(p_ref[...], h_f32, preferred_element_type=jnp.float32)
    o_ref[...] = (jnp.dot(pooled, lw_ref[...],
                          preferred_element_type=jnp.float32) + lb_ref[...])


def _fused_call(a_p, x_p, w_p, b_p, gm_p, bt_p, p_p, lw_p, lb_p, *, n_real):
    n_pad = a_p.shape[0]
    d = x_p.shape[1]
    num_layers = w_p.shape[0]
    g_pad = p_p.shape[0]
    c_pad = lw_p.shape[1]

    flops = (num_layers * (2 * n_pad * d * d + 2 * n_pad * n_pad * d)
             + 2 * g_pad * n_pad * d + 2 * g_pad * d * c_pad)
    bytes_accessed = (a_p.size * 2 + x_p.size * 2 + w_p.size * 2
                      + (b_p.size + gm_p.size + bt_p.size) * 4
                      + p_p.size * 4 + lw_p.size * 4 + lb_p.size * 4
                      + g_pad * c_pad * 4)
    # Inputs + output + a handful of f32 activation temporaries, with headroom;
    # stay within v7x's 64 MiB per-core VMEM.
    vmem_bytes = int(min(64 * 1024 * 1024,
                         max(8 * 1024 * 1024,
                             2 * bytes_accessed + 8 * n_pad * d * 4)))
    if 2 * bytes_accessed + 8 * n_pad * d * 4 > 48 * 1024 * 1024:
        raise ValueError(
            "Graph too large for the fully fused VMEM-resident kernel; "
            "see TODO(synk) about the row-tiled block-sparse path.")

    kernel = functools.partial(_gcn_fused_kernel, n_real=n_real)
    return pl.pallas_call(
        kernel,
        out_shape=jax.ShapeDtypeStruct((g_pad, c_pad), jnp.float32),
        in_specs=[
            _full(a_p.shape), _full(x_p.shape), _full(w_p.shape),
            _full(b_p.shape), _full(gm_p.shape), _full(bt_p.shape),
            _full(p_p.shape), _full(lw_p.shape), _full(lb_p.shape),
        ],
        out_specs=_full((g_pad, c_pad)),
        compiler_params=pltpu.CompilerParams(vmem_limit_bytes=vmem_bytes),
        cost_estimate=pl.CostEstimate(flops=flops,
                                      transcendentals=num_layers * d,
                                      bytes_accessed=bytes_accessed),
    )(a_p, x_p, w_p, b_p, gm_p, bt_p, p_p, lw_p, lb_p)


# ---------------------------------------------------------------------------
# Model: parameter init + forward (padding glue in plain JAX, hot path in Pallas)
# ---------------------------------------------------------------------------
def init_gcn_params(key, num_node_features, hidden_channels, num_classes, num_layers):
    """Glorot-uniform conv/linear weights, zero conv bias, BN gamma=1 / beta=0."""
    def glorot(k, fan_in, fan_out):
        lim = jnp.sqrt(6.0 / (fan_in + fan_out))
        return jax.random.uniform(k, (fan_in, fan_out), jnp.float32, -lim, lim)

    dims = [num_node_features] + [hidden_channels] * (3 + int(num_layers))
    layers = []
    for f_in, f_out in zip(dims[:-1], dims[1:]):
        key, kw = jax.random.split(key)
        layers.append(dict(
            w=glorot(kw, f_in, f_out),
            b=jnp.zeros((1, f_out), jnp.float32),
            gamma=jnp.ones((1, f_out), jnp.float32),
            beta=jnp.zeros((1, f_out), jnp.float32),
        ))
    key, kl, kb = jax.random.split(key, 3)
    lin_w = glorot(kl, hidden_channels, num_classes)
    lim = 1.0 / jnp.sqrt(hidden_channels)
    lin_b = jax.random.uniform(kb, (1, num_classes), jnp.float32, -lim, lim)
    return dict(layers=layers, lin_w=lin_w, lin_b=lin_b)


def build_normalized_adjacency(edge_index, num_nodes):
    """A_hat = D^-1/2 (A + I) D^-1/2 (GCNConv symmetric normalization + self-loops)."""
    adj = jnp.zeros((num_nodes, num_nodes), jnp.float32)
    adj = adj.at[edge_index[0], edge_index[1]].max(1.0)       # dedupe duplicate edges
    adj = jnp.maximum(adj, jnp.eye(num_nodes, dtype=jnp.float32))
    deg = adj.sum(axis=1)
    d_inv_sqrt = jax.lax.rsqrt(deg)
    return d_inv_sqrt[:, None] * adj * d_inv_sqrt[None, :]


def build_pool_matrix(batch, num_graphs):
    onehot = (batch[None, :] == jnp.arange(num_graphs)[:, None]).astype(jnp.float32)
    counts = jnp.maximum(onehot.sum(axis=1, keepdims=True), 1.0)
    return onehot / counts  # (G, N) rows sum to 1 -> mean pooling


@jax.jit
def gcn_forward(params, a_hat, x, pool_mat):
    n, f_in = x.shape
    hidden = params["layers"][0]["w"].shape[1]
    num_classes = params["lin_w"].shape[1]
    num_graphs = pool_mat.shape[0]

    n_pad = _round_up(n, LANE)
    d = _round_up(max(f_in, hidden), LANE)
    c_pad = _round_up(num_classes, LANE)
    g_pad = _round_up(num_graphs, SUBLANE)

    a_p = _pad_to(a_hat, (n_pad, n_pad)).astype(jnp.bfloat16)
    x_p = _pad_to(x, (n_pad, d)).astype(jnp.bfloat16)
    w_p = jnp.stack([_pad_to(l["w"], (d, d)) for l in params["layers"]]
                    ).astype(jnp.bfloat16)
    b_p = jnp.stack([_pad_to(l["b"], (1, d)) for l in params["layers"]])
    gm_p = jnp.stack([_pad_to(l["gamma"], (1, d)) for l in params["layers"]])
    bt_p = jnp.stack([_pad_to(l["beta"], (1, d)) for l in params["layers"]])
    p_p = _pad_to(pool_mat, (g_pad, n_pad)).astype(jnp.float32)
    lw_p = _pad_to(params["lin_w"], (d, c_pad))
    lb_p = _pad_to(params["lin_b"], (1, c_pad))

    out_pad = _fused_call(a_p, x_p, w_p, b_p, gm_p, bt_p, p_p, lw_p, lb_p, n_real=n)
    return out_pad[:num_graphs, :num_classes]


def gcn_reference(params, a_hat, x, pool_mat):
    """Pure-JAX reference with the same bf16-MXU / f32-accumulate numerics."""
    a_bf = a_hat.astype(jnp.bfloat16)
    h = x.astype(jnp.bfloat16)
    hf = x
    for layer in params["layers"]:
        xw = jnp.dot(h, layer["w"].astype(jnp.bfloat16),
                     preferred_element_type=jnp.float32)
        hh = jnp.dot(a_bf, xw.astype(jnp.bfloat16),
                     preferred_element_type=jnp.float32) + layer["b"]
        mean = jnp.mean(hh, axis=0, keepdims=True)
        var = jnp.maximum(jnp.mean(hh * hh, axis=0, keepdims=True) - mean * mean, 0.0)
        hn = (hh - mean) * jax.lax.rsqrt(var + 1e-5) * layer["gamma"] + layer["beta"]
        hf = jnp.maximum(hn, 0.0)
        h = hf.astype(jnp.bfloat16)
    pooled = jnp.dot(pool_mat, hf, preferred_element_type=jnp.float32)
    return jnp.dot(pooled, params["lin_w"],
                   preferred_element_type=jnp.float32) + params["lin_b"]


# ---------------------------------------------------------------------------
if __name__ == "__main__":
    key = jax.random.PRNGKey(0)

    NUM_NODES = 16          # total nodes across the batch of graphs
    NUM_NODE_FEATURES = 8
    HIDDEN_CHANNELS = 32
    NUM_CLASSES = 3
    NUM_LAYERS = 2          # extra GCNConv layers beyond conv1..conv3
    NUM_GRAPHS = 2
    NUM_EDGES = 32

    key, kx, ks, kd = jax.random.split(key, 4)
    x = jax.random.normal(kx, (NUM_NODES, NUM_NODE_FEATURES), jnp.float32)
    src = jax.random.randint(ks, (NUM_EDGES,), 0, NUM_NODES)
    dst = jax.random.randint(kd, (NUM_EDGES,), 0, NUM_NODES)
    edge_index = jnp.stack([src, dst]).astype(jnp.int32)                     # (2, E)
    batch = jnp.repeat(jnp.arange(NUM_GRAPHS), NUM_NODES // NUM_GRAPHS)      # (N,)

    params = init_gcn_params(
        key, NUM_NODE_FEATURES, HIDDEN_CHANNELS, NUM_CLASSES, NUM_LAYERS)
    a_hat = build_normalized_adjacency(edge_index, NUM_NODES)                # (N, N)
    pool_mat = build_pool_matrix(batch, NUM_GRAPHS)                          # (G, N)

    out = gcn_forward(params, a_hat, x, pool_mat)                            # (G, C)
    jax.block_until_ready(out)
    assert out.shape == (NUM_GRAPHS, NUM_CLASSES)

    ref = gcn_reference(params, a_hat, x, pool_mat)
    assert bool(jnp.allclose(out, ref, atol=1e-2, rtol=1e-2)), (
        f"mismatch vs reference: max |diff| = {float(jnp.max(jnp.abs(out - ref)))}")

    print("KERNEL_OK")
</pallas_src>

<mosaic_0001>
module attributes {stable_mosaic.version = 11 : i64} {
  func.func @_gcn_fused_kernel(%arg0: memref<128x128xbf16, #tpu.memory_space<vmem>>, %arg1: memref<128x128xbf16, #tpu.memory_space<vmem>>, %arg2: memref<5x128x128xbf16, #tpu.memory_space<vmem>>, %arg3: memref<5x1x128xf32, #tpu.memory_space<vmem>>, %arg4: memref<5x1x128xf32, #tpu.memory_space<vmem>>, %arg5: memref<5x1x128xf32, #tpu.memory_space<vmem>>, %arg6: memref<8x128xf32, #tpu.memory_space<vmem>>, %arg7: memref<128x128xf32, #tpu.memory_space<vmem>>, %arg8: memref<1x128xf32, #tpu.memory_space<vmem>>, %arg9: memref<8x128xf32, #tpu.memory_space<vmem>>) attributes {dimension_semantics = [], scalar_prefetch = 0 : i64, scratch_operands = 0 : i64, tpu.core_type = #tpu.core_type<tc>} {
    %0 = tpu.iota {dimensions = array<i32: 0>} : vector<128x1xi32>
    %c16_i32 = arith.constant 16 : i32
    %1 = vector.broadcast %c16_i32 : i32 to vector<128x1xi32>
    %2 = arith.cmpi slt, %0, %1 : vector<128x1xi32>
    %3 = arith.extui %2 : vector<128x1xi1> to vector<128x1xi32>
    %4 = arith.sitofp %3 : vector<128x1xi32> to vector<128x1xf32>
    %c0 = arith.constant 0 : index
    %c0_0 = arith.constant 0 : index
    %5 = vector.load %arg0[%c0, %c0_0] : memref<128x128xbf16, #tpu.memory_space<vmem>>, vector<128x128xbf16>
    %c0_1 = arith.constant 0 : index
    %c0_2 = arith.constant 0 : index
    %6 = vector.load %arg1[%c0_1, %c0_2] : memref<128x128xbf16, #tpu.memory_space<vmem>>, vector<128x128xbf16>
    %c0_3 = arith.constant 0 : index
    %c0_4 = arith.constant 0 : index
    %c0_5 = arith.constant 0 : index
    %7 = vector.load %arg2[%c0_3, %c0_4, %c0_5] : memref<5x128x128xbf16, #tpu.memory_space<vmem>>, vector<1x128x128xbf16>
    %8 = vector.shape_cast %7 : vector<1x128x128xbf16> to vector<128x128xbf16>
    %cst = arith.constant dense<0.000000e+00> : vector<128x128xf32>
    %9 = tpu.matmul %6, %8, %cst {dimension_numbers = #tpu.dot_dimension_numbers<[1], [0], [0], [1], [0, 0, 1, 1], [], []>} : vector<128x128xbf16>, vector<128x128xbf16>, vector<128x128xf32> -> vector<128x128xf32>
    %10 = arith.truncf %9 : vector<128x128xf32> to vector<128x128xbf16>
    %cst_6 = arith.constant dense<0.000000e+00> : vector<128x128xf32>
    %11 = tpu.matmul %5, %10, %cst_6 {dimension_numbers = #tpu.dot_dimension_numbers<[1], [0], [0], [1], [0, 0, 1, 1], [], []>} : vector<128x128xbf16>, vector<128x128xbf16>, vector<128x128xf32> -> vector<128x128xf32>
    %c0_7 = arith.constant 0 : index
    %c0_8 = arith.constant 0 : index
    %c0_9 = arith.constant 0 : index
    %12 = vector.load %arg3[%c0_7, %c0_8, %c0_9] : memref<5x1x128xf32, #tpu.memory_space<vmem>>, vector<1x1x128xf32>
    %13 = vector.shape_cast %12 : vector<1x1x128xf32> to vector<1x128xf32>
    %14 = vector.broadcast %13 : vector<1x128xf32> to vector<128x128xf32>
    %15 = arith.addf %11, %14 : vector<128x128xf32>
    %16 = vector.broadcast %4 : vector<128x1xf32> to vector<128x128xf32>
    %17 = arith.mulf %15, %16 : vector<128x128xf32>
    %cst_10 = arith.constant dense<0.000000e+00> : vector<128xf32>
    %18 = vector.multi_reduction <add>, %17, %cst_10 [0] : vector<128x128xf32> to vector<128xf32>
    %19 = vector.shape_cast %18 : vector<128xf32> to vector<1x128xf32>
    %cst_11 = arith.constant 6.250000e-02 : f32
    %20 = vector.broadcast %cst_11 : f32 to vector<1x128xf32>
    %21 = arith.mulf %19, %20 : vector<1x128xf32>
    %22 = arith.mulf %17, %17 : vector<128x128xf32>
    %cst_12 = arith.constant dense<0.000000e+00> : vector<128xf32>
    %23 = vector.multi_reduction <add>, %22, %cst_12 [0] : vector<128x128xf32> to vector<128xf32>
    %24 = vector.shape_cast %23 : vector<128xf32> to vector<1x128xf32>
    %cst_13 = arith.constant 6.250000e-02 : f32
    %25 = vector.broadcast %cst_13 : f32 to vector<1x128xf32>
    %26 = arith.mulf %24, %25 : vector<1x128xf32>
    %27 = arith.mulf %21, %21 : vector<1x128xf32>
    %28 = arith.subf %26, %27 : vector<1x128xf32>
    %cst_14 = arith.constant 0.000000e+00 : f32
    %29 = vector.broadcast %cst_14 : f32 to vector<1x128xf32>
    %30 = arith.maximumf %28, %29 : vector<1x128xf32>
    %31 = vector.broadcast %21 : vector<1x128xf32> to vector<128x128xf32>
    %32 = arith.subf %17, %31 : vector<128x128xf32>
    %cst_15 = arith.constant 9.99999974E-6 : f32
    %33 = vector.broadcast %cst_15 : f32 to vector<1x128xf32>
    %34 = arith.addf %30, %33 : vector<1x128xf32>
    %35 = math.rsqrt %34 : vector<1x128xf32>
    %36 = vector.broadcast %35 : vector<1x128xf32> to vector<128x128xf32>
    %37 = arith.mulf %32, %36 : vector<128x128xf32>
    %c0_16 = arith.constant 0 : index
    %c0_17 = arith.constant 0 : index
    %c0_18 = arith.constant 0 : index
    %38 = vector.load %arg4[%c0_16, %c0_17, %c0_18] : memref<5x1x128xf32, #tpu.memory_space<vmem>>, vector<1x1x128xf32>
    %39 = vector.shape_cast %38 : vector<1x1x128xf32> to vector<1x128xf32>
    %40 = vector.broadcast %39 : vector<1x128xf32> to vector<128x128xf32>
    %41 = arith.mulf %37, %40 : vector<128x128xf32>
    %c0_19 = arith.constant 0 : index
    %c0_20 = arith.constant 0 : index
    %c0_21 = arith.constant 0 : index
    %42 = vector.load %arg5[%c0_19, %c0_20, %c0_21] : memref<5x1x128xf32, #tpu.memory_space<vmem>>, vector<1x1x128xf32>
    %43 = vector.shape_cast %42 : vector<1x1x128xf32> to vector<1x128xf32>
    %44 = vector.broadcast %43 : vector<1x128xf32> to vector<128x128xf32>
    %45 = arith.addf %41, %44 : vector<128x128xf32>
    %cst_22 = arith.constant 0.000000e+00 : f32
    %46 = vector.broadcast %cst_22 : f32 to vector<128x128xf32>
    %47 = arith.maximumf %45, %46 : vector<128x128xf32>
    %48 = vector.broadcast %4 : vector<128x1xf32> to vector<128x128xf32>
    %49 = arith.mulf %47, %48 : vector<128x128xf32>
    %50 = arith.truncf %49 : vector<128x128xf32> to vector<128x128xbf16>
    %c1 = arith.constant 1 : index
    %c0_23 = arith.constant 0 : index
    %c0_24 = arith.constant 0 : index
    %51 = vector.load %arg2[%c1, %c0_23, %c0_24] : memref<5x128x128xbf16, #tpu.memory_space<vmem>>, vector<1x128x128xbf16>
    %52 = vector.shape_cast %51 : vector<1x128x128xbf16> to vector<128x128xbf16>
    %cst_25 = arith.constant dense<0.000000e+00> : vector<128x128xf32>
    %53 = tpu.matmul %50, %52, %cst_25 {dimension_numbers = #tpu.dot_dimension_numbers<[1], [0], [0], [1], [0, 0, 1, 1], [], []>} : vector<128x128xbf16>, vector<128x128xbf16>, vector<128x128xf32> -> vector<128x128xf32>
    %54 = arith.truncf %53 : vector<128x128xf32> to vector<128x128xbf16>
    %cst_26 = arith.constant dense<0.000000e+00> : vector<128x128xf32>
    %55 = tpu.matmul %5, %54, %cst_26 {dimension_numbers = #tpu.dot_dimension_numbers<[1], [0], [0], [1], [0, 0, 1, 1], [], []>} : vector<128x128xbf16>, vector<128x128xbf16>, vector<128x128xf32> -> vector<128x128xf32>
    %c1_27 = arith.constant 1 : index
    %c0_28 = arith.constant 0 : index
    %c0_29 = arith.constant 0 : index
    %56 = vector.load %arg3[%c1_27, %c0_28, %c0_29] : memref<5x1x128xf32, #tpu.memory_space<vmem>>, vector<1x1x128xf32>
    %57 = vector.shape_cast %56 : vector<1x1x128xf32> to vector<1x128xf32>
    %58 = vector.broadcast %57 : vector<1x128xf32> to vector<128x128xf32>
    %59 = arith.addf %55, %58 : vector<128x128xf32>
    %60 = vector.broadcast %4 : vector<128x1xf32> to vector<128x128xf32>
    %61 = arith.mulf %59, %60 : vector<128x128xf32>
    %cst_30 = arith.constant dense<0.000000e+00> : vector<128xf32>
    %62 = vector.multi_reduction <add>, %61, %cst_30 [0] : vector<128x128xf32> to vector<128xf32>
    %63 = vector.shape_cast %62 : vector<128xf32> to vector<1x128xf32>
    %cst_31 = arith.constant 6.250000e-02 : f32
    %64 = vector.broadcast %cst_31 : f32 to vector<1x128xf32>
    %65 = arith.mulf %63, %64 : vector<1x128xf32>
    %66 = arith.mulf %61, %61 : vector<128x128xf32>
    %cst_32 = arith.constant dense<0.000000e+00> : vector<128xf32>
    %67 = vector.multi_reduction <add>, %66, %cst_32 [0] : vector<128x128xf32> to vector<128xf32>
    %68 = vector.shape_cast %67 : vector<128xf32> to vector<1x128xf32>
    %cst_33 = arith.constant 6.250000e-02 : f32
    %69 = vector.broadcast %cst_33 : f32 to vector<1x128xf32>
    %70 = arith.mulf %68, %69 : vector<1x128xf32>
    %71 = arith.mulf %65, %65 : vector<1x128xf32>
    %72 = arith.subf %70, %71 : vector<1x128xf32>
    %cst_34 = arith.constant 0.000000e+00 : f32
    %73 = vector.broadcast %cst_34 : f32 to vector<1x128xf32>
    %74 = arith.maximumf %72, %73 : vector<1x128xf32>
    %75 = vector.broadcast %65 : vector<1x128xf32> to vector<128x128xf32>
    %76 = arith.subf %61, %75 : vector<128x128xf32>
    %cst_35 = arith.constant 9.99999974E-6 : f32
    %77 = vector.broadcast %cst_35 : f32 to vector<1x128xf32>
    %78 = arith.addf %74, %77 : vector<1x128xf32>
    %79 = math.rsqrt %78 : vector<1x128xf32>
    %80 = vector.broadcast %79 : vector<1x128xf32> to vector<128x128xf32>
    %81 = arith.mulf %76, %80 : vector<128x128xf32>
    %c1_36 = arith.constant 1 : index
    %c0_37 = arith.constant 0 : index
    %c0_38 = arith.constant 0 : index
    %82 = vector.load %arg4[%c1_36, %c0_37, %c0_38] : memref<5x1x128xf32, #tpu.memory_space<vmem>>, vector<1x1x128xf32>
    %83 = vector.shape_cast %82 : vector<1x1x128xf32> to vector<1x128xf32>
    %84 = vector.broadcast %83 : vector<1x128xf32> to vector<128x128xf32>
    %85 = arith.mulf %81, %84 : vector<128x128xf32>
    %c1_39 = arith.constant 1 : index
    %c0_40 = arith.constant 0 : index
    %c0_41 = arith.constant 0 : index
    %86 = vector.load %arg5[%c1_39, %c0_40, %c0_41] : memref<5x1x128xf32, #tpu.memory_space<vmem>>, vector<1x1x128xf32>
    %87 = vector.shape_cast %86 : vector<1x1x128xf32> to vector<1x128xf32>
    %88 = vector.broadcast %87 : vector<1x128xf32> to vector<128x128xf32>
    %89 = arith.addf %85, %88 : vector<128x128xf32>
    %cst_42 = arith.constant 0.000000e+00 : f32
    %90 = vector.broadcast %cst_42 : f32 to vector<128x128xf32>
    %91 = arith.maximumf %89, %90 : vector<128x128xf32>
    %92 = vector.broadcast %4 : vector<128x1xf32> to vector<128x128xf32>
    %93 = arith.mulf %91, %92 : vector<128x128xf32>
    %94 = arith.truncf %93 : vector<128x128xf32> to vector<128x128xbf16>
    %c2 = arith.constant 2 : index
    %c0_43 = arith.constant 0 : index
    %c0_44 = arith.constant 0 : index
    %95 = vector.load %arg2[%c2, %c0_43, %c0_44] : memref<5x128x128xbf16, #tpu.memory_space<vmem>>, vector<1x128x128xbf16>
    %96 = vector.shape_cast %95 : vector<1x128x128xbf16> to vector<128x128xbf16>
    %cst_45 = arith.constant dense<0.000000e+00> : vector<128x128xf32>
    %97 = tpu.matmul %94, %96, %cst_45 {dimension_numbers = #tpu.dot_dimension_numbers<[1], [0], [0], [1], [0, 0, 1, 1], [], []>} : vector<128x128xbf16>, vector<128x128xbf16>, vector<128x128xf32> -> vector<128x128xf32>
    %98 = arith.truncf %97 : vector<128x128xf32> to vector<128x128xbf16>
    %cst_46 = arith.constant dense<0.000000e+00> : vector<128x128xf32>
    %99 = tpu.matmul %5, %98, %cst_46 {dimension_numbers = #tpu.dot_dimension_numbers<[1], [0], [0], [1], [0, 0, 1, 1], [], []>} : vector<128x128xbf16>, vector<128x128xbf16>, vector<128x128xf32> -> vector<128x128xf32>
    %c2_47 = arith.constant 2 : index
    %c0_48 = arith.constant 0 : index
    %c0_49 = arith.constant 0 : index
    %100 = vector.load %arg3[%c2_47, %c0_48, %c0_49] : memref<5x1x128xf32, #tpu.memory_space<vmem>>, vector<1x1x128xf32>
    %101 = vector.shape_cast %100 : vector<1x1x128xf32> to vector<1x128xf32>
    %102 = vector.broadcast %101 : vector<1x128xf32> to vector<128x128xf32>
    %103 = arith.addf %99, %102 : vector<128x128xf32>
    %104 = vector.broadcast %4 : vector<128x1xf32> to vector<128x128xf32>
    %105 = arith.mulf %103, %104 : vector<128x128xf32>
    %cst_50 = arith.constant dense<0.000000e+00> : vector<128xf32>
    %106 = vector.multi_reduction <add>, %105, %cst_50 [0] : vector<128x128xf32> to vector<128xf32>
    %107 = vector.shape_cast %106 : vector<128xf32> to vector<1x128xf32>
    %cst_51 = arith.constant 6.250000e-02 : f32
    %108 = vector.broadcast %cst_51 : f32 to vector<1x128xf32>
    %109 = arith.mulf %107, %108 : vector<1x128xf32>
    %110 = arith.mulf %105, %105 : vector<128x128xf32>
    %cst_52 = arith.constant dense<0.000000e+00> : vector<128xf32>
    %111 = vector.multi_reduction <add>, %110, %cst_52 [0] : vector<128x128xf32> to vector<128xf32>
    %112 = vector.shape_cast %111 : vector<128xf32> to vector<1x128xf32>
    %cst_53 = arith.constant 6.250000e-02 : f32
    %113 = vector.broadcast %cst_53 : f32 to vector<1x128xf32>
    %114 = arith.mulf %112, %113 : vector<1x128xf32>
    %115 = arith.mulf %109, %109 : vector<1x128xf32>
    %116 = arith.subf %114, %115 : vector<1x128xf32>
    %cst_54 = arith.constant 0.000000e+00 : f32
    %117 = vector.broadcast %cst_54 : f32 to vector<1x128xf32>
    %118 = arith.maximumf %116, %117 : vector<1x128xf32>
    %119 = vector.broadcast %109 : vector<1x128xf32> to vector<128x128xf32>
    %120 = arith.subf %105, %119 : vector<128x128xf32>
    %cst_55 = arith.constant 9.99999974E-6 : f32
    %121 = vector.broadcast %cst_55 : f32 to vector<1x128xf32>
    %122 = arith.addf %118, %121 : vector<1x128xf32>
    %123 = math.rsqrt %122 : vector<1x128xf32>
    %124 = vector.broadcast %123 : vector<1x128xf32> to vector<128x128xf32>
    %125 = arith.mulf %120, %124 : vector<128x128xf32>
    %c2_56 = arith.constant 2 : index
    %c0_57 = arith.constant 0 : index
    %c0_58 = arith.constant 0 : index
    %126 = vector.load %arg4[%c2_56, %c0_57, %c0_58] : memref<5x1x128xf32, #tpu.memory_space<vmem>>, vector<1x1x128xf32>
    %127 = vector.shape_cast %126 : vector<1x1x128xf32> to vector<1x128xf32>
    %128 = vector.broadcast %127 : vector<1x128xf32> to vector<128x128xf32>
    %129 = arith.mulf %125, %128 : vector<128x128xf32>
    %c2_59 = arith.constant 2 : index
    %c0_60 = arith.constant 0 : index
    %c0_61 = arith.constant 0 : index
    %130 = vector.load %arg5[%c2_59, %c0_60, %c0_61] : memref<5x1x128xf32, #tpu.memory_space<vmem>>, vector<1x1x128xf32>
    %131 = vector.shape_cast %130 : vector<1x1x128xf32> to vector<1x128xf32>
    %132 = vector.broadcast %131 : vector<1x128xf32> to vector<128x128xf32>
    %133 = arith.addf %129, %132 : vector<128x128xf32>
    %cst_62 = arith.constant 0.000000e+00 : f32
    %134 = vector.broadcast %cst_62 : f32 to vector<128x128xf32>
    %135 = arith.maximumf %133, %134 : vector<128x128xf32>
    %136 = vector.broadcast %4 : vector<128x1xf32> to vector<128x128xf32>
    %137 = arith.mulf %135, %136 : vector<128x128xf32>
    %138 = arith.truncf %137 : vector<128x128xf32> to vector<128x128xbf16>
    %c3 = arith.constant 3 : index
    %c0_63 = arith.constant 0 : index
    %c0_64 = arith.constant 0 : index
    %139 = vector.load %arg2[%c3, %c0_63, %c0_64] : memref<5x128x128xbf16, #tpu.memory_space<vmem>>, vector<1x128x128xbf16>
    %140 = vector.shape_cast %139 : vector<1x128x128xbf16> to vector<128x128xbf16>
    %cst_65 = arith.constant dense<0.000000e+00> : vector<128x128xf32>
    %141 = tpu.matmul %138, %140, %cst_65 {dimension_numbers = #tpu.dot_dimension_numbers<[1], [0], [0], [1], [0, 0, 1, 1], [], []>} : vector<128x128xbf16>, vector<128x128xbf16>, vector<128x128xf32> -> vector<128x128xf32>
    %142 = arith.truncf %141 : vector<128x128xf32> to vector<128x128xbf16>
    %cst_66 = arith.constant dense<0.000000e+00> : vector<128x128xf32>
    %143 = tpu.matmul %5, %142, %cst_66 {dimension_numbers = #tpu.dot_dimension_numbers<[1], [0], [0], [1], [0, 0, 1, 1], [], []>} : vector<128x128xbf16>, vector<128x128xbf16>, vector<128x128xf32> -> vector<128x128xf32>
    %c3_67 = arith.constant 3 : index
    %c0_68 = arith.constant 0 : index
    %c0_69 = arith.constant 0 : index
    %144 = vector.load %arg3[%c3_67, %c0_68, %c0_69] : memref<5x1x128xf32, #tpu.memory_space<vmem>>, vector<1x1x128xf32>
    %145 = vector.shape_cast %144 : vector<1x1x128xf32> to vector<1x128xf32>
    %146 = vector.broadcast %145 : vector<1x128xf32> to vector<128x128xf32>
    %147 = arith.addf %143, %146 : vector<128x128xf32>
    %148 = vector.broadcast %4 : vector<128x1xf32> to vector<128x128xf32>
    %149 = arith.mulf %147, %148 : vector<128x128xf32>
    %cst_70 = arith.constant dense<0.000000e+00> : vector<128xf32>
    %150 = vector.multi_reduction <add>, %149, %cst_70 [0] : vector<128x128xf32> to vector<128xf32>
    %151 = vector.shape_cast %150 : vector<128xf32> to vector<1x128xf32>
    %cst_71 = arith.constant 6.250000e-02 : f32
    %152 = vector.broadcast %cst_71 : f32 to vector<1x128xf32>
    %153 = arith.mulf %151, %152 : vector<1x128xf32>
    %154 = arith.mulf %149, %149 : vector<128x128xf32>
    %cst_72 = arith.constant dense<0.000000e+00> : vector<128xf32>
    %155 = vector.multi_reduction <add>, %154, %cst_72 [0] : vector<128x128xf32> to vector<128xf32>
    %156 = vector.shape_cast %155 : vector<128xf32> to vector<1x128xf32>
    %cst_73 = arith.constant 6.250000e-02 : f32
    %157 = vector.broadcast %cst_73 : f32 to vector<1x128xf32>
    %158 = arith.mulf %156, %157 : vector<1x128xf32>
    %159 = arith.mulf %153, %153 : vector<1x128xf32>
    %160 = arith.subf %158, %159 : vector<1x128xf32>
    %cst_74 = arith.constant 0.000000e+00 : f32
    %161 = vector.broadcast %cst_74 : f32 to vector<1x128xf32>
    %162 = arith.maximumf %160, %161 : vector<1x128xf32>
    %163 = vector.broadcast %153 : vector<1x128xf32> to vector<128x128xf32>
    %164 = arith.subf %149, %163 : vector<128x128xf32>
    %cst_75 = arith.constant 9.99999974E-6 : f32
    %165 = vector.broadcast %cst_75 : f32 to vector<1x128xf32>
    %166 = arith.addf %162, %165 : vector<1x128xf32>
    %167 = math.rsqrt %166 : vector<1x128xf32>
    %168 = vector.broadcast %167 : vector<1x128xf32> to vector<128x128xf32>
    %169 = arith.mulf %164, %168 : vector<128x128xf32>
    %c3_76 = arith.constant 3 : index
    %c0_77 = arith.constant 0 : index
    %c0_78 = arith.constant 0 : index
    %170 = vector.load %arg4[%c3_76, %c0_77, %c0_78] : memref<5x1x128xf32, #tpu.memory_space<vmem>>, vector<1x1x128xf32>
    %171 = vector.shape_cast %170 : vector<1x1x128xf32> to vector<1x128xf32>
    %172 = vector.broadcast %171 : vector<1x128xf32> to vector<128x128xf32>
    %173 = arith.mulf %169, %172 : vector<128x128xf32>
    %c3_79 = arith.constant 3 : index
    %c0_80 = arith.constant 0 : index
    %c0_81 = arith.constant 0 : index
    %174 = vector.load %arg5[%c3_79, %c0_80, %c0_81] : memref<5x1x128xf32, #tpu.memory_space<vmem>>, vector<1x1x128xf32>
    %175 = vector.shape_cast %174 : vector<1x1x128xf32> to vector<1x128xf32>
    %176 = vector.broadcast %175 : vector<1x128xf32> to vector<128x128xf32>
    %177 = arith.addf %173, %176 : vector<128x128xf32>
    %cst_82 = arith.constant 0.000000e+00 : f32
    %178 = vector.broadcast %cst_82 : f32 to vector<128x128xf32>
    %179 = arith.maximumf %177, %178 : vector<128x128xf32>
    %180 = vector.broadcast %4 : vector<128x1xf32> to vector<128x128xf32>
    %181 = arith.mulf %179, %180 : vector<128x128xf32>
    %182 = arith.truncf %181 : vector<128x128xf32> to vector<128x128xbf16>
    %c4 = arith.constant 4 : index
    %c0_83 = arith.constant 0 : index
    %c0_84 = arith.constant 0 : index
    %183 = vector.load %arg2[%c4, %c0_83, %c0_84] : memref<5x128x128xbf16, #tpu.memory_space<vmem>>, vector<1x128x128xbf16>
    %184 = vector.shape_cast %183 : vector<1x128x128xbf16> to vector<128x128xbf16>
    %cst_85 = arith.constant dense<0.000000e+00> : vector<128x128xf32>
    %185 = tpu.matmul %182, %184, %cst_85 {dimension_numbers = #tpu.dot_dimension_numbers<[1], [0], [0], [1], [0, 0, 1, 1], [], []>} : vector<128x128xbf16>, vector<128x128xbf16>, vector<128x128xf32> -> vector<128x128xf32>
    %186 = arith.truncf %185 : vector<128x128xf32> to vector<128x128xbf16>
    %cst_86 = arith.constant dense<0.000000e+00> : vector<128x128xf32>
    %187 = tpu.matmul %5, %186, %cst_86 {dimension_numbers = #tpu.dot_dimension_numbers<[1], [0], [0], [1], [0, 0, 1, 1], [], []>} : vector<128x128xbf16>, vector<128x128xbf16>, vector<128x128xf32> -> vector<128x128xf32>
    %c4_87 = arith.constant 4 : index
    %c0_88 = arith.constant 0 : index
    %c0_89 = arith.constant 0 : index
    %188 = vector.load %arg3[%c4_87, %c0_88, %c0_89] : memref<5x1x128xf32, #tpu.memory_space<vmem>>, vector<1x1x128xf32>
    %189 = vector.shape_cast %188 : vector<1x1x128xf32> to vector<1x128xf32>
    %190 = vector.broadcast %189 : vector<1x128xf32> to vector<128x128xf32>
    %191 = arith.addf %187, %190 : vector<128x128xf32>
    %192 = vector.broadcast %4 : vector<128x1xf32> to vector<128x128xf32>
    %193 = arith.mulf %191, %192 : vector<128x128xf32>
    %cst_90 = arith.constant dense<0.000000e+00> : vector<128xf32>
    %194 = vector.multi_reduction <add>, %193, %cst_90 [0] : vector<128x128xf32> to vector<128xf32>
    %195 = vector.shape_cast %194 : vector<128xf32> to vector<1x128xf32>
    %cst_91 = arith.constant 6.250000e-02 : f32
    %196 = vector.broadcast %cst_91 : f32 to vector<1x128xf32>
    %197 = arith.mulf %195, %196 : vector<1x128xf32>
    %198 = arith.mulf %193, %193 : vector<128x128xf32>
    %cst_92 = arith.constant dense<0.000000e+00> : vector<128xf32>
    %199 = vector.multi_reduction <add>, %198, %cst_92 [0] : vector<128x128xf32> to vector<128xf32>
    %200 = vector.shape_cast %199 : vector<128xf32> to vector<1x128xf32>
    %cst_93 = arith.constant 6.250000e-02 : f32
    %201 = vector.broadcast %cst_93 : f32 to vector<1x128xf32>
    %202 = arith.mulf %200, %201 : vector<1x128xf32>
    %203 = arith.mulf %197, %197 : vector<1x128xf32>
    %204 = arith.subf %202, %203 : vector<1x128xf32>
    %cst_94 = arith.constant 0.000000e+00 : f32
    %205 = vector.broadcast %cst_94 : f32 to vector<1x128xf32>
    %206 = arith.maximumf %204, %205 : vector<1x128xf32>
    %207 = vector.broadcast %197 : vector<1x128xf32> to vector<128x128xf32>
    %208 = arith.subf %193, %207 : vector<128x128xf32>
    %cst_95 = arith.constant 9.99999974E-6 : f32
    %209 = vector.broadcast %cst_95 : f32 to vector<1x128xf32>
    %210 = arith.addf %206, %209 : vector<1x128xf32>
    %211 = math.rsqrt %210 : vector<1x128xf32>
    %212 = vector.broadcast %211 : vector<1x128xf32> to vector<128x128xf32>
    %213 = arith.mulf %208, %212 : vector<128x128xf32>
    %c4_96 = arith.constant 4 : index
    %c0_97 = arith.constant 0 : index
    %c0_98 = arith.constant 0 : index
    %214 = vector.load %arg4[%c4_96, %c0_97, %c0_98] : memref<5x1x128xf32, #tpu.memory_space<vmem>>, vector<1x1x128xf32>
    %215 = vector.shape_cast %214 : vector<1x1x128xf32> to vector<1x128xf32>
    %216 = vector.broadcast %215 : vector<1x128xf32> to vector<128x128xf32>
    %217 = arith.mulf %213, %216 : vector<128x128xf32>
    %c4_99 = arith.constant 4 : index
    %c0_100 = arith.constant 0 : index
    %c0_101 = arith.constant 0 : index
    %218 = vector.load %arg5[%c4_99, %c0_100, %c0_101] : memref<5x1x128xf32, #tpu.memory_space<vmem>>, vector<1x1x128xf32>
    %219 = vector.shape_cast %218 : vector<1x1x128xf32> to vector<1x128xf32>
    %220 = vector.broadcast %219 : vector<1x128xf32> to vector<128x128xf32>
    %221 = arith.addf %217, %220 : vector<128x128xf32>
    %cst_102 = arith.constant 0.000000e+00 : f32
    %222 = vector.broadcast %cst_102 : f32 to vector<128x128xf32>
    %223 = arith.maximumf %221, %222 : vector<128x128xf32>
    %224 = vector.broadcast %4 : vector<128x1xf32> to vector<128x128xf32>
    %225 = arith.mulf %223, %224 : vector<128x128xf32>
    %c0_103 = arith.constant 0 : index
    %c0_104 = arith.constant 0 : index
    %226 = vector.load %arg6[%c0_103, %c0_104] : memref<8x128xf32, #tpu.memory_space<vmem>>, vector<8x128xf32>
    %cst_105 = arith.constant dense<0.000000e+00> : vector<8x128xf32>
    %227 = tpu.matmul %226, %225, %cst_105 {dimension_numbers = #tpu.dot_dimension_numbers<[1], [0], [0], [1], [0, 0, 1, 1], [], []>} : vector<8x128xf32>, vector<128x128xf32>, vector<8x128xf32> -> vector<8x128xf32>
    %c0_106 = arith.constant 0 : index
    %c0_107 = arith.constant 0 : index
    %228 = vector.load %arg7[%c0_106, %c0_107] : memref<128x128xf32, #tpu.memory_space<vmem>>, vector<128x128xf32>
    %cst_108 = arith.constant dense<0.000000e+00> : vector<8x128xf32>
    %229 = tpu.matmul %227, %228, %cst_108 {dimension_numbers = #tpu.dot_dimension_numbers<[1], [0], [0], [1], [0, 0, 1, 1], [], []>} : vector<8x128xf32>, vector<128x128xf32>, vector<8x128xf32> -> vector<8x128xf32>
    %c0_109 = arith.constant 0 : index
    %c0_110 = arith.constant 0 : index
    %230 = vector.load %arg8[%c0_109, %c0_110] : memref<1x128xf32, #tpu.memory_space<vmem>>, vector<1x128xf32>
    %231 = vector.broadcast %230 : vector<1x128xf32> to vector<8x128xf32>
    %232 = arith.addf %229, %231 : vector<8x128xf32>
    %c0_111 = arith.constant 0 : index
    %c0_112 = arith.constant 0 : index
    %233 = vector.load %arg9[%c0_111, %c0_112] : memref<8x128xf32, #tpu.memory_space<vmem>>, vector<8x128xf32>
    tpu.vector_store %arg9[%c0_111, %c0_112], %232 {strides = array<i32>} : memref<8x128xf32, #tpu.memory_space<vmem>>, vector<8x128xf32>,
    return
  }
}

</mosaic_0001>

<bundles_post_ra>
// kernel: gcn_forward.1
= control target key start
LH: loop header
LB: loop body
LE: loop exit
PB: predicated region body
PF: predicated region fallthrough
CT: control target
= control target key end

     0   :  { %vm3628_vm0 = vmmov 0   ;;  %s5016_s2 = inlined_call_operand.vmem [shape: bf16[5,128,128], index: 2, kind: input, shape index: {}]   ;;  %s5017_s1 = inlined_call_operand.vmem [shape: bf16[128,128], index: 1, kind: input, shape index: {}]   ;;  %s5018_s0 = inlined_call_operand.vmem [shape: bf16[128,128], index: 0, kind: input, shape index: {}]   ;;  %s5019_s3 = inlined_call_operand.vmem [shape: f32[5,1,128], index: 3, kind: input, shape index: {}]   ;;  %s5020_s4 = inlined_call_operand.vmem [shape: f32[5,1,128], index: 4, kind: input, shape index: {}]   ;;  %s5021_s5 = inlined_call_operand.vmem [shape: f32[5,1,128], index: 5, kind: input, shape index: {}]   ;;  %s5022_s7 = inlined_call_operand.vmem [shape: f32[128,128], index: 7, kind: input, shape index: {}]   ;;  %s5023_s6 = inlined_call_operand.vmem [shape: f32[8,128], index: 6, kind: input, shape index: {}]   ;;  %s5024_s8 = inlined_call_operand.vmem [shape: f32[1,128], index: 8, kind: input, shape index: {}]   ;;  %s5025_s9 = inlined_call_operand.vmem [shape: f32[8,128], index: 9, kind: output, shape index: {}]  }
   0x1   :  { %v3546_v0 = vld [vmem:[%s5016_s2] sm:$0xff]   ;;  %v3547_v1 = vld [vmem:[%s5016_s2 + $0x8] sm:$0xff]   ;;  %v3548_v2 = vld [vmem:[%s5016_s2 + $0x10] sm:$0xff]  }
   0x2   :  { %3105 = vmatprep.subr.bf16.mxu0 %v3546_v0  ;;  %v3549_v3 = vld [vmem:[%s5016_s2 + $0x18] sm:$0xff]   ;;  %v3554_v4 = vld [vmem:[%s5017_s1] sm:$0xff]   ;;  %v3551_v6 = vld [vmem:[%s5016_s2 + $0x28] sm:$0xff]  }
   0x3   :  { %3106 = vmatpush3.bf16.msra.mxu0 %v3546_v0  ;;  %3121 = vmatprep.mubr.bf16.mxu0 %v3554_v4  ;;  %v3550_v5 = vld [vmem:[%s5016_s2 + $0x20] sm:$0xff]   ;;  %v3552_v7 = vld [vmem:[%s5016_s2 + $0x30] sm:$0xff]   ;;  %v3553_v8 = vld [vmem:[%s5016_s2 + $0x38] sm:$0xff]  }
   0x4   :  { %3107 = vmatprep.subr.bf16.mxu0 %v3547_v1  ;;  %v3555_v9 = vld [vmem:[%s5017_s1 + $0x8] sm:$0xff]   ;;  %v3556_v10 = vld [vmem:[%s5017_s1 + $0x10] sm:$0xff]   ;;  %v3557_v11 = vld [vmem:[%s5017_s1 + $0x18] sm:$0xff]  }
   0x5   :  { %v3558_v12 = vld [vmem:[%s5017_s1 + $0x20] sm:$0xff]   ;;  %v3559_v13 = vld [vmem:[%s5017_s1 + $0x28] sm:$0xff]   ;;  %v3560_v14 = vld [vmem:[%s5017_s1 + $0x30] sm:$0xff]  }
   0x6   :  { %v3561_v15 = vld [vmem:[%s5017_s1 + $0x38] sm:$0xff]   ;;  %v3731_v16 = vld [vmem:[%s5018_s0] sm:$0xff]   ;;  %v3737_v41 = vld [vmem:[%s5018_s0 + $0x8] sm:$0xff]  }
   0x7   :  { %3108 = vmatpush3.bf16.msra.mxu0 %v3547_v1  ;;  %3153 = vmatprep.mubr.bf16.mxu1 %v3731_v16  ;;  %v3742_v42 = vld [vmem:[%s5018_s0 + $0x10] sm:$0xff]   ;;  %v3749_v43 = vld [vmem:[%s5018_s0 + $0x18] sm:$0xff]   ;;  %v3754_v44 = vld [vmem:[%s5018_s0 + $0x20] sm:$0xff]  }
   0x8   :  { %3109 = vmatprep.subr.bf16.mxu0 %v3548_v2  ;;  %v3761_v45 = vld [vmem:[%s5018_s0 + $0x28] sm:$0xff]   ;;  %v3766_v46 = vld [vmem:[%s5018_s0 + $0x30] sm:$0xff]   ;;  %v3773_v47 = vld [vmem:[%s5018_s0 + $0x38] sm:$0xff]  }
   0x9   :  { %v3570_v48 = vld [vmem:[%s5016_s2 + $0x40] sm:$0xff]   ;;  %v3571_v49 = vld [vmem:[%s5016_s2 + $0x48] sm:$0xff]   ;;  %v3572_v50 = vld [vmem:[%s5016_s2 + $0x50] sm:$0xff]  }
   0xa   :  { %v3573_v51 = vld [vmem:[%s5016_s2 + $0x58] sm:$0xff]   ;;  %v3574_v52 = vld [vmem:[%s5016_s2 + $0x60] sm:$0xff]   ;;  %v3575_v53 = vld [vmem:[%s5016_s2 + $0x68] sm:$0xff]  }
   0xb   :  { %3110 = vmatpush3.bf16.msra.mxu0 %v3548_v2  ;;  %v3576_v54 = vld [vmem:[%s5016_s2 + $0x70] sm:$0xff]   ;;  %v3577_v55 = vld [vmem:[%s5016_s2 + $0x78] sm:$0xff]   ;;  %v3804_v56 = vld [vmem:[%s5019_s3] ss:$0 sm:$0xff] }
   0xc   :  { %3111 = vmatprep.subr.bf16.mxu0 %v3549_v3 }
   0xf   :  { %3112 = vmatpush3.bf16.msra.mxu0 %v3549_v3 }
  0x10   :  { %3113 = vmatprep.subr.bf16.mxu0 %v3550_v5 }
  0x13   :  { %3114 = vmatpush3.bf16.msra.mxu0 %v3550_v5 }
  0x14   :  { %3115 = vmatprep.subr.bf16.mxu0 %v3551_v6 }
  0x17   :  { %3116 = vmatpush3.bf16.msra.mxu0 %v3551_v6 }
  0x18   :  { %3117 = vmatprep.subr.bf16.mxu0 %v3552_v7 }
  0x1b   :  { %3118 = vmatpush3.bf16.msra.mxu0 %v3552_v7 }
  0x1c   :  { %3119 = vmatprep.subr.bf16.mxu0 %v3553_v8 }
  0x1f   :  { %3120 = vmatpush3.bf16.msra.mxu0 %v3553_v8 }
  0x20   :  { %3169 = vmatprep.subr.bf16.mxu0 %v3570_v48 }
  0x22   :  { %3122 = vmatmul.mubr.bf16.vlgmr.msra.gmra.mrb[0].mxu0 %v3555_v9 }
  0x23   :  { %3125 = vmatprep.mubr.bf16.mxu0 %v3556_v10  ;;  %3170 = vmatpush3.bf16.msra.mxu0 %v3570_v48 }
  0x24   :  { %3171 = vmatprep.subr.bf16.mxu0 %v3571_v49 }
  0x27   :  { %3172 = vmatpush3.bf16.msra.mxu0 %v3571_v49 }
  0x28   :  { %3173 = vmatprep.subr.bf16.mxu0 %v3572_v50 }
  0x2a   :  { %3126 = vmatmul.mubr.bf16.gmra.mrb[4].mxu0 %v3557_v11 }
  0x2b   :  { %3129 = vmatprep.mubr.bf16.mxu0 %v3558_v12  ;;  %3174 = vmatpush3.bf16.msra.mxu0 %v3572_v50 }
  0x2c   :  { %3175 = vmatprep.subr.bf16.mxu0 %v3573_v51 }
  0x2f   :  { %3176 = vmatpush3.bf16.msra.mxu0 %v3573_v51 }
  0x30   :  { %3177 = vmatprep.subr.bf16.mxu0 %v3574_v52 }
  0x32   :  { %3130 = vmatmul.mubr.bf16.gmra.mrb[8].mxu0 %v3559_v13 }
  0x33   :  { %3133 = vmatprep.mubr.bf16.mxu0 %v3560_v14  ;;  %3178 = vmatpush3.bf16.msra.mxu0 %v3574_v52 }
  0x34   :  { %3179 = vmatprep.subr.bf16.mxu0 %v3575_v53 }
  0x37   :  { %3180 = vmatpush3.bf16.msra.mxu0 %v3575_v53 }
  0x38   :  { %3181 = vmatprep.subr.bf16.mxu0 %v3576_v54 }
  0x3a   :  { %3134 = vmatmul.mubr.bf16.gmra.mrb[12].mxu0 %v3561_v15 }
  0x3b   :  { %3182 = vmatpush3.bf16.msra.mxu0 %v3576_v54 }
  0x3c   :  { %3183 = vmatprep.subr.bf16.mxu0 %v3577_v55 }
  0x3f   :  { %3184 = vmatpush3.bf16.msra.mxu0 %v3577_v55 }
  0xf5   :  { %v3123_v17 = vpop.f32.mrb[0].mxu0 }
  0xf6   :  { %v276_v18 = vpop.f32.mrb[1].mxu0 }
  0xf7   :  { %v3124_v19 = vpop.f32.mrb[2].mxu0 }
  0xf8   :  { %v340_v20 = vpack.c.bf16 %v3124_v19, %v3123_v17  ;;  %v279_v21 = vpop.f32.mrb[3].mxu0 }
  0xf9   :  { %v339_v22 = vpack.c.bf16 %v279_v21, %v276_v18 }
  0xfb   :  { %3137 = vmatprep.subr.bf16.mxu1 %v339_v22 }
  0xfc   :  { %3138 = vmatpush3.bf16.msra.mxu1 %v339_v22 }
  0xfd   :  { %v3127_v23 = vpop.f32.mrb[4].mxu0  ;;  %3139 = vmatprep.subr.bf16.mxu1 %v340_v20 }
  0xfe   :  { %v292_v24 = vpop.f32.mrb[5].mxu0 }
  0xff   :  { %v3128_v25 = vpop.f32.mrb[6].mxu0 }
 0x100   :  { %v342_v26 = vpack.c.bf16 %v3128_v25, %v3127_v23  ;;  %v295_v27 = vpop.f32.mrb[7].mxu0  ;;  %3140 = vmatpush3.bf16.msra.mxu1 %v340_v20 }
 0x101   :  { %v341_v28 = vpack.c.bf16 %v295_v27, %v292_v24 }
 0x103   :  { %3141 = vmatprep.subr.bf16.mxu1 %v341_v28 }
 0x104   :  { %3142 = vmatpush3.bf16.msra.mxu1 %v341_v28 }
 0x105   :  { %v3131_v29 = vpop.f32.mrb[8].mxu0  ;;  %3143 = vmatprep.subr.bf16.mxu1 %v342_v26 }
 0x106   :  { %v308_v30 = vpop.f32.mrb[9].mxu0 }
 0x107   :  { %v3132_v31 = vpop.f32.mrb[10].mxu0 }
 0x108   :  { %v344_v32 = vpack.c.bf16 %v3132_v31, %v3131_v29  ;;  %v311_v33 = vpop.f32.mrb[11].mxu0  ;;  %3144 = vmatpush3.bf16.msra.mxu1 %v342_v26 }
 0x109   :  { %v343_v34 = vpack.c.bf16 %v311_v33, %v308_v30 }
 0x10b   :  { %3145 = vmatprep.subr.bf16.mxu1 %v343_v34 }
 0x10c   :  { %3146 = vmatpush3.bf16.msra.mxu1 %v343_v34 }
 0x10d   :  { %v3135_v35 = vpop.f32.mrb[12].mxu0  ;;  %3147 = vmatprep.subr.bf16.mxu1 %v344_v32 }
 0x10e   :  { %v324_v36 = vpop.f32.mrb[13].mxu0 }
 0x10f   :  { %v3136_v37 = vpop.f32.mrb[14].mxu0 }
 0x110   :  { %v346_v38 = vpack.c.bf16 %v3136_v37, %v3135_v35  ;;  %v327_v39 = vpop.f32.mrb[15].mxu0  ;;  %3148 = vmatpush3.bf16.msra.mxu1 %v344_v32 }
 0x111   :  { %v345_v40 = vpack.c.bf16 %v327_v39, %v324_v36 }
 0x113   :  { %3149 = vmatprep.subr.bf16.mxu1 %v345_v40 }
 0x114   :  { %3150 = vmatpush3.bf16.msra.mxu1 %v345_v40 }
 0x115   :  { %3151 = vmatprep.subr.bf16.mxu1 %v346_v38 }
 0x118   :  { %3152 = vmatpush3.bf16.msra.mxu1 %v346_v38 }
 0x11b   :  { %3154 = vmatmul.mubr.bf16.vlgmr.msra.gmra.mrb[0].mxu1 %v3737_v41 }
 0x11c   :  { %3157 = vmatprep.mubr.bf16.mxu1 %v3742_v42 }
 0x123   :  { %3158 = vmatmul.mubr.bf16.gmra.mrb[4].mxu1 %v3749_v43 }
 0x124   :  { %3161 = vmatprep.mubr.bf16.mxu1 %v3754_v44 }
 0x12b   :  { %3162 = vmatmul.mubr.bf16.gmra.mrb[8].mxu1 %v3761_v45 }
 0x12c   :  { %3165 = vmatprep.mubr.bf16.mxu1 %v3766_v46 }
 0x133   :  { %3166 = vmatmul.mubr.bf16.gmra.mrb[12].mxu1 %v3773_v47 }
 0x134   :  { %3217 = vmatprep.mubr.bf16.mxu1 %v3731_v16 }
 0x1ee   :  { %v3155_v57 = vpop.f32.mrb[0].mxu1 }
 0x1ef   :  { %v445_v58 = vadd.f32 %v3155_v57, %v3804_v56  ;;  %v436_v59 = vpop.f32.mrb[1].mxu1 }
 0x1f0   :  { %v3808_v60 = vadd.f32 %v3804_v56, %v436_v59  ;;  %v3156_v61 = vpop.f32.mrb[2].mxu1 }
 0x1f1   :  { %v448_v62 = vadd.f32 %v3156_v61, %v3804_v56  ;;  %v439_v63 = vpop.f32.mrb[3].mxu1  ;;  %v3811_v0 = vmul.f32 0.0, %v445_v58 }
 0x1f2   :  { %v3814_v1 = vadd.f32 %v3804_v56, %v439_v63  ;;  %v537_v3 = vmul.f32 %v3808_v60, %v3808_v60 }
 0x1f3   :  { %v3816_v2 = vmul.f32 0.0, %v448_v62  ;;  %v539_v6 = vmul.f32 %v3811_v0, %v3811_v0 }
 0x1f4   :  { %v515_v4 = vadd.f32 %v3814_v1, %v3808_v60  ;;  %v538_v5 = vmul.f32 %v3814_v1, %v3814_v1 }
 0x1f5   :  { %v540_v10 = vmul.f32 %v3816_v2, %v3816_v2 }
 0x1f6   :  { %v516_v7 = vadd.f32 %v515_v4, %v3811_v0  ;;  %v553_v8 = vadd.f32 %v538_v5, %v537_v3  ;;  %v3159_v9 = vpop.f32.mrb[4].mxu1 }
 0x1f7   :  { %v452_v11 = vpop.f32.mrb[5].mxu1  ;;  %v461_v13 = vadd.f32 %v3159_v9, %v3804_v56 }
 0x1f8   :  { %v554_v12 = vadd.f32 %v553_v8, %v539_v6  ;;  %v453_v14 = vadd.f32 %v3804_v56, %v452_v11  ;;  %v517_v15 = vadd.f32 %v516_v7, %v3816_v2  ;;  %v3160_v17 = vpop.f32.mrb[6].mxu1 }
 0x1f9   :  { %v464_v18 = vadd.f32 %v3160_v17, %v3804_v56  ;;  %v455_v19 = vpop.f32.mrb[7].mxu1  ;;  %v3836_v23 = vmul.f32 0.0, %v461_v13 }
 0x1fa   :  { %v3833_v20 = vmul.f32 0.0, %v453_v14  ;;  %v555_v21 = vadd.f32 %v554_v12, %v540_v10  ;;  %v456_v22 = vadd.f32 %v3804_v56, %v455_v19 }
 0x1fb   :  { %v3843_v27 = vmul.f32 0.0, %v464_v18  ;;  %v543_v34 = vmul.f32 %v3836_v23, %v3836_v23 }
 0x1fc   :  { %v518_v24 = vadd.f32 %v517_v15, %v3833_v20  ;;  %v541_v25 = vmul.f32 %v3833_v20, %v3833_v20  ;;  %v3841_v26 = vmul.f32 0.0, %v456_v22 }
 0x1fd   :  { %v544_v39 = vmul.f32 %v3843_v27, %v3843_v27 }
 0x1fe   :  { %v556_v28 = vadd.f32 %v555_v21, %v541_v25  ;;  %v519_v29 = vadd.f32 %v518_v24, %v3841_v26  ;;  %v542_v30 = vmul.f32 %v3841_v26, %v3841_v26  ;;  %v3163_v31 = vpop.f32.mrb[8].mxu1 }
 0x1ff   :  { %v477_v32 = vadd.f32 %v3163_v31, %v3804_v56  ;;  %v468_v33 = vpop.f32.mrb[9].mxu1 }
 0x200   :  { %v520_v35 = vadd.f32 %v519_v29, %v3836_v23  ;;  %v557_v36 = vadd.f32 %v556_v28, %v542_v30  ;;  %v469_v37 = vadd.f32 %v3804_v56, %v468_v33  ;;  %v3164_v38 = vpop.f32.mrb[10].mxu1 }
 0x201   :  { %v480_v40 = vadd.f32 %v3164_v38, %v3804_v56  ;;  %v471_v48 = vpop.f32.mrb[11].mxu1  ;;  %v3860_v53 = vmul.f32 0.0, %v477_v32 }
 0x202   :  { %v558_v49 = vadd.f32 %v557_v36, %v543_v34  ;;  %v3856_v50 = vmul.f32 0.0, %v469_v37  ;;  %v521_v51 = vadd.f32 %v520_v35, %v3843_v27  ;;  %v472_v52 = vadd.f32 %v3804_v56, %v471_v48 }
 0x203   :  { %v3867_v59 = vmul.f32 0.0, %v480_v40  ;;  %v547_v6 = vmul.f32 %v3860_v53, %v3860_v53 }
 0x204   :  { %v522_v54 = vadd.f32 %v521_v51, %v3856_v50  ;;  %v545_v55 = vmul.f32 %v3856_v50, %v3856_v50  ;;  %v559_v57 = vadd.f32 %v558_v49, %v544_v39  ;;  %v3865_v58 = vmul.f32 0.0, %v472_v52 }
 0x205   :  { %v548_v11 = vmul.f32 %v3867_v59, %v3867_v59 }
 0x206   :  { %v560_v61 = vadd.f32 %v559_v57, %v545_v55  ;;  %v523_v62 = vadd.f32 %v522_v54, %v3865_v58  ;;  %v546_v63 = vmul.f32 %v3865_v58, %v3865_v58  ;;  %v3167_v3 = vpop.f32.mrb[12].mxu1 }
 0x207   :  { %v493_v4 = vadd.f32 %v3167_v3, %v3804_v56  ;;  %v484_v5 = vpop.f32.mrb[13].mxu1 }
 0x208   :  { %v524_v7 = vadd.f32 %v523_v62, %v3860_v53  ;;  %v561_v8 = vadd.f32 %v560_v61, %v546_v63  ;;  %v485_v9 = vadd.f32 %v3804_v56, %v484_v5  ;;  %v3168_v10 = vpop.f32.mrb[14].mxu1 }
 0x209   :  { %v496_v12 = vadd.f32 %v3168_v10, %v3804_v56  ;;  %v487_v13 = vpop.f32.mrb[15].mxu1  ;;  %v3884_v19 = vmul.f32 0.0, %v493_v4 }
 0x20a   :  { %v562_v14 = vadd.f32 %v561_v8, %v547_v6  ;;  %v3880_v15 = vmul.f32 0.0, %v485_v9  ;;  %v525_v17 = vadd.f32 %v524_v7, %v3867_v59  ;;  %v488_v18 = vadd.f32 %v3804_v56, %v487_v13 }
 0x20b   :  { %v3889_v29 = vmul.f32 0.0, %v496_v12  ;;  %v551_v32 = vmul.f32 %v3884_v19, %v3884_v19 }
 0x20c   :  { %v526_v21 = vadd.f32 %v525_v17, %v3880_v15  ;;  %v549_v22 = vmul.f32 %v3880_v15, %v3880_v15  ;;  %v563_v24 = vadd.f32 %v562_v14, %v548_v11  ;;  %v512_v25 = vmul.f32 0.0, %v488_v18 }
 0x20d   :  { %v552_v34 = vmul.f32 %v3889_v29, %v3889_v29 }
 0x20e   :  { %v564_v28 = vadd.f32 %v563_v24, %v549_v22  ;;  %v527_v30 = vadd.f32 %v526_v21, %v512_v25  ;;  %v550_v31 = vmul.f32 %v512_v25, %v512_v25  ;;  %v3946_v21 = vld [vmem:[%s5021_s5] ss:$0 sm:$0xff] }
 0x210   :  { %v528_v33 = vadd.f32 %v527_v30, %v3884_v19  ;;  %v565_v56 = vadd.f32 %v564_v28, %v550_v31 }
 0x212   :  { %v529_v35 = vadd.f32 %v528_v33, %v3889_v29  ;;  %v566_v36 = vadd.f32 %v565_v56, %v551_v32 }
 0x214   :  { %v530_v37 = vrot.slane %v529_v35, 4  ;;  %v567_v38 = vadd.f32 %v566_v36, %v552_v34 }
 0x216   :  { %v531_v39 = vadd.f32 %v530_v37, %v529_v35  ;;  %v568_v40 = vrot.slane %v567_v38, 4 }
 0x218   :  { %v532_v48 = vrot.slane %v531_v39, 2  ;;  %v569_v49 = vadd.f32 %v568_v40, %v567_v38 }
 0x21a   :  { %v533_v51 = vadd.f32 %v532_v48, %v531_v39  ;;  %v570_v52 = vrot.slane %v569_v49, 2 }
 0x21c   :  { %v534_v54 = vrot.slane %v533_v51, 1  ;;  %v571_v55 = vadd.f32 %v570_v52, %v569_v49 }
 0x21e   :  { %v535_v57 = vadd.f32 %v534_v54, %v533_v51  ;;  %v572_v61 = vrot.slane %v571_v55, 1 }
 0x220   :  { %v3897_v62 = vmul.f32 0.0625, %v535_v57  ;;  %v573_v63 = vadd.f32 %v572_v61, %v571_v55 }
 0x222   :  { %v574_v3 = vmul.f32 0.0625, %v573_v63  ;;  %v575_v4 = vmul.f32 %v3897_v62, %v3897_v62  ;;  %v591_v5 = vsub.f32 %v512_v25, %v3897_v62  ;;  %v578_v6 = vsub.f32 %v3808_v60, %v3897_v62 }
 0x223   :  { %v579_v7 = vsub.f32 %v3814_v1, %v3897_v62  ;;  %v580_v8 = vsub.f32 %v3811_v0, %v3897_v62  ;;  %v581_v9 = vsub.f32 %v3816_v2, %v3897_v62  ;;  %v582_v10 = vsub.f32 %v3833_v20, %v3897_v62 }
 0x224   :  { %v576_v11 = vsub.f32 %v574_v3, %v575_v4  ;;  %v583_v12 = vsub.f32 %v3841_v26, %v3897_v62  ;;  %v584_v13 = vsub.f32 %v3836_v23, %v3897_v62  ;;  %v585_v60 = vsub.f32 %v3843_v27, %v3897_v62 }
 0x225   :  { %v586_v1 = vsub.f32 %v3856_v50, %v3897_v62  ;;  %v587_v0 = vsub.f32 %v3865_v58, %v3897_v62  ;;  %v588_v2 = vsub.f32 %v3860_v53, %v3897_v62  ;;  %v589_v20 = vsub.f32 %v3867_v59, %v3897_v62  ;;  %v3937_v53 = vld [vmem:[%s5020_s4] ss:$0 sm:$0xff] }
 0x226   :  { %v577_v14 = vmax.f32 %v576_v11, 0.0  ;;  %v590_v26 = vsub.f32 %v3880_v15, %v3897_v62  ;;  %v592_v23 = vsub.f32 %v3884_v19, %v3897_v62  ;;  %v593_v27 = vsub.f32 %v3889_v29, %v3897_v62 }
 0x228   :  { %v594_v50 = vadd.f32 1e-05, %v577_v14 }
 0x22a   :  { %3602 = vrsqrt.f32 %v594_v50 }
 0x234   :  { %v3932_v17 = vpop.eup %3602 }
 0x235   :  { %v609_v58 = vmul.f32 %v3932_v17, %v591_v5  ;;  %v596_v59 = vmul.f32 %v3932_v17, %v578_v6  ;;  %v597_v15 = vmul.f32 %v3932_v17, %v579_v7  ;;  %v598_v18 = vmul.f32 %v3932_v17, %v580_v8 }
 0x236   :  { %v599_v22 = vmul.f32 %v3932_v17, %v581_v9  ;;  %v600_v24 = vmul.f32 %v3932_v17, %v582_v10  ;;  %v601_v25 = vmul.f32 %v3932_v17, %v583_v12  ;;  %v602_v28 = vmul.f32 %v3932_v17, %v584_v13 }
 0x237   :  { %v619_v30 = vmul.f32 %v3937_v53, %v596_v59  ;;  %v620_v31 = vmul.f32 %v3937_v53, %v597_v15  ;;  %v621_v32 = vmul.f32 %v3937_v53, %v598_v18  ;;  %v603_v33 = vmul.f32 %v3932_v17, %v585_v60 }
 0x238   :  { %v622_v56 = vmul.f32 %v3937_v53, %v599_v22  ;;  %v623_v34 = vmul.f32 %v3937_v53, %v600_v24  ;;  %v624_v35 = vmul.f32 %v3937_v53, %v601_v25  ;;  %v625_v36 = vmul.f32 %v3937_v53, %v602_v28 }
 0x239   :  { %v642_v37 = vadd.f32 %v3946_v21, %v619_v30  ;;  %v643_v38 = vadd.f32 %v3946_v21, %v620_v31  ;;  %v644_v39 = vadd.f32 %v3946_v21, %v621_v32  ;;  %v626_v40 = vmul.f32 %v3937_v53, %v603_v33 }
 0x23a   :  { %v645_v48 = vadd.f32 %v3946_v21, %v622_v56  ;;  %v646_v49 = vadd.f32 %v3946_v21, %v623_v34  ;;  %v647_v51 = vadd.f32 %v3946_v21, %v624_v35  ;;  %v648_v52 = vadd.f32 %v3946_v21, %v625_v36 }
 0x23b   :  { %v658_v54 = vmax.f32 %v642_v37, 0.0  ;;  %v659_v55 = vmax.f32 %v643_v38, 0.0  ;;  %v660_v57 = vmax.f32 %v644_v39, 0.0  ;;  %v649_v61 = vadd.f32 %v3946_v21, %v626_v40 }
 0x23c   :  { %v661_v63 = vmax.f32 %v645_v48, 0.0  ;;  %v662_v3 = vmax.f32 %v646_v49, 0.0  ;;  %v663_v4 = vmax.f32 %v647_v51, 0.0  ;;  %v664_v5 = vmax.f32 %v648_v52, 0.0 }
 0x23d   :  { %v690_v6 = vpack.c.bf16 %v659_v55, %v658_v54  ;;  %v676_v7 = vmul.f32 0.0, %v660_v57  ;;  %v665_v8 = vmax.f32 %v649_v61, 0.0  ;;  %v604_v9 = vmul.f32 %v3932_v17, %v586_v1 }
 0x23e   :  { %v677_v10 = vmul.f32 0.0, %v661_v63  ;;  %v678_v11 = vmul.f32 0.0, %v662_v3  ;;  %v679_v12 = vmul.f32 0.0, %v663_v4  ;;  %v680_v13 = vmul.f32 0.0, %v664_v5 }
 0x23f   :  { %3185 = vmatprep.mubr.bf16.mxu0 %v690_v6  ;;  %v681_v60 = vmul.f32 0.0, %v665_v8  ;;  %v605_v14 = vmul.f32 %v3932_v17, %v587_v0  ;;  %v627_v50 = vmul.f32 %v3937_v53, %v604_v9  ;;  %v606_v59 = vmul.f32 %v3932_v17, %v588_v2 }
 0x240   :  { %v691_v15 = vpack.c.bf16 %v677_v10, %v676_v7  ;;  %v692_v18 = vpack.c.bf16 %v679_v12, %v678_v11  ;;  %v607_v22 = vmul.f32 %v3932_v17, %v589_v20  ;;  %v608_v24 = vmul.f32 %v3932_v17, %v590_v26 }
 0x241   :  { %v693_v25 = vpack.c.bf16 %v681_v60, %v680_v13  ;;  %v628_v1 = vmul.f32 %v3937_v53, %v605_v14  ;;  %v650_v28 = vadd.f32 %v3946_v21, %v627_v50  ;;  %v629_v30 = vmul.f32 %v3937_v53, %v606_v59 }
 0x242   :  { %3186 = vmatmul.mubr.bf16.vlgmr.msra.gmra.mrb[16].mxu0 %v691_v15  ;;  %v630_v0 = vmul.f32 %v3937_v53, %v607_v22  ;;  %v631_v31 = vmul.f32 %v3937_v53, %v608_v24  ;;  %v632_v2 = vmul.f32 %v3937_v53, %v609_v58  ;;  %v610_v20 = vmul.f32 %v3932_v17, %v592_v23 }
 0x243   :  { %3189 = vmatprep.mubr.bf16.mxu0 %v692_v18  ;;  %v651_v26 = vadd.f32 %v3946_v21, %v628_v1  ;;  %v666_v32 = vmax.f32 %v650_v28, 0.0  ;;  %v652_v33 = vadd.f32 %v3946_v21, %v629_v30  ;;  %v611_v56 = vmul.f32 %v3932_v17, %v593_v27 }
 0x244   :  { %v653_v34 = vadd.f32 %v3946_v21, %v630_v0  ;;  %v654_v58 = vadd.f32 %v3946_v21, %v631_v31  ;;  %v655_v35 = vadd.f32 %v3946_v21, %v632_v2  ;;  %v633_v19 = vmul.f32 %v3937_v53, %v610_v20  ;;  %v3578_v2 = vld [vmem:[%s5016_s2 + $0x80] sm:$0xff]  }
 0x245   :  { %v667_v23 = vmax.f32 %v651_v26, 0.0  ;;  %v682_v36 = vmul.f32 0.0, %v666_v32  ;;  %v668_v37 = vmax.f32 %v652_v33, 0.0  ;;  %v634_v38 = vmul.f32 %v3937_v53, %v611_v56  ;;  %3233 = vmatprep.subr.bf16.mxu0 %v3578_v2 }
 0x246   :  { %v669_v39 = vmax.f32 %v653_v34, 0.0  ;;  %v670_v40 = vmax.f32 %v654_v58, 0.0  ;;  %v671_v48 = vmax.f32 %v655_v35, 0.0  ;;  %v656_v29 = vadd.f32 %v3946_v21, %v633_v19  ;;  %3234 = vmatpush3.bf16.msra.mxu0 %v3578_v2 }
 0x247   :  { %v683_v62 = vmul.f32 0.0, %v667_v23  ;;  %v684_v27 = vmul.f32 0.0, %v668_v37  ;;  %v657_v17 = vadd.f32 %v3946_v21, %v634_v38 }
 0x248   :  { %v685_v49 = vmul.f32 0.0, %v669_v39  ;;  %v686_v51 = vmul.f32 0.0, %v670_v40  ;;  %v687_v52 = vmul.f32 0.0, %v671_v48  ;;  %v672_v54 = vmax.f32 %v656_v29, 0.0 }
 0x249   :  { %v694_v55 = vpack.c.bf16 %v683_v62, %v682_v36  ;;  %v673_v57 = vmax.f32 %v657_v17, 0.0 }
 0x24a   :  { %3190 = vmatmul.mubr.bf16.gmra.mrb[20].mxu0 %v693_v25  ;;  %v695_v61 = vpack.c.bf16 %v685_v49, %v684_v27  ;;  %v696_v63 = vpack.c.bf16 %v687_v52, %v686_v51  ;;  %v688_v3 = vmul.f32 0.0, %v672_v54 }
 0x24b   :  { %3193 = vmatprep.mubr.bf16.mxu0 %v694_v55  ;;  %v689_v53 = vmul.f32 0.0, %v673_v57 }
 0x24d   :  { %v697_v4 = vpack.c.bf16 %v689_v53, %v688_v3 }
 0x252   :  { %3194 = vmatmul.mubr.bf16.gmra.mrb[24].mxu0 %v695_v61 }
 0x253   :  { %3197 = vmatprep.mubr.bf16.mxu0 %v696_v63 }
 0x25a   :  { %3198 = vmatmul.mubr.bf16.gmra.mrb[28].mxu0 %v697_v4 }
 0x315   :  { %v3187_v5 = vpop.f32.mrb[16].mxu0 }
 0x316   :  { %v797_v6 = vpop.f32.mrb[17].mxu0 }
 0x317   :  { %v3188_v7 = vpop.f32.mrb[18].mxu0 }
 0x318   :  { %v861_v21 = vpack.c.bf16 %v3188_v7, %v3187_v5  ;;  %v800_v8 = vpop.f32.mrb[19].mxu0 }
 0x319   :  { %v860_v9 = vpack.c.bf16 %v800_v8, %v797_v6 }
 0x31b   :  { %3201 = vmatprep.subr.bf16.mxu1 %v860_v9 }
 0x31c   :  { %3202 = vmatpush3.bf16.msra.mxu1 %v860_v9 }
 0x31d   :  { %v3191_v10 = vpop.f32.mrb[20].mxu0  ;;  %3203 = vmatprep.subr.bf16.mxu1 %v861_v21 }
 0x31e   :  { %v813_v11 = vpop.f32.mrb[21].mxu0 }
 0x31f   :  { %v3192_v12 = vpop.f32.mrb[22].mxu0 }
 0x320   :  { %v863_v13 = vpack.c.bf16 %v3192_v12, %v3191_v10  ;;  %v816_v60 = vpop.f32.mrb[23].mxu0  ;;  %3204 = vmatpush3.bf16.msra.mxu1 %v861_v21 }
 0x321   :  { %v862_v14 = vpack.c.bf16 %v816_v60, %v813_v11 }
 0x323   :  { %3205 = vmatprep.subr.bf16.mxu1 %v862_v14 }
 0x324   :  { %3206 = vmatpush3.bf16.msra.mxu1 %v862_v14 }
 0x325   :  { %v3195_v50 = vpop.f32.mrb[24].mxu0  ;;  %3207 = vmatprep.subr.bf16.mxu1 %v863_v13 }
 0x326   :  { %v829_v59 = vpop.f32.mrb[25].mxu0 }
 0x327   :  { %v3196_v15 = vpop.f32.mrb[26].mxu0 }
 0x328   :  { %v865_v18 = vpack.c.bf16 %v3196_v15, %v3195_v50  ;;  %v832_v22 = vpop.f32.mrb[27].mxu0  ;;  %3208 = vmatpush3.bf16.msra.mxu1 %v863_v13 }
 0x329   :  { %v864_v24 = vpack.c.bf16 %v832_v22, %v829_v59 }
 0x32b   :  { %3209 = vmatprep.subr.bf16.mxu1 %v864_v24 }
 0x32c   :  { %3210 = vmatpush3.bf16.msra.mxu1 %v864_v24 }
 0x32d   :  { %v3199_v25 = vpop.f32.mrb[28].mxu0  ;;  %3211 = vmatprep.subr.bf16.mxu1 %v865_v18 }
 0x32e   :  { %v845_v1 = vpop.f32.mrb[29].mxu0 }
 0x32f   :  { %v3200_v28 = vpop.f32.mrb[30].mxu0 }
 0x330   :  { %v867_v30 = vpack.c.bf16 %v3200_v28, %v3199_v25  ;;  %v848_v0 = vpop.f32.mrb[31].mxu0  ;;  %3212 = vmatpush3.bf16.msra.mxu1 %v865_v18 }
 0x331   :  { %v866_v31 = vpack.c.bf16 %v848_v0, %v845_v1 }
 0x333   :  { %3213 = vmatprep.subr.bf16.mxu1 %v866_v31 }
 0x334   :  { %3214 = vmatpush3.bf16.msra.mxu1 %v866_v31 }
 0x335   :  { %3215 = vmatprep.subr.bf16.mxu1 %v867_v30 }
 0x338   :  { %3216 = vmatpush3.bf16.msra.mxu1 %v867_v30 }
 0x33b   :  { %3218 = vmatmul.mubr.bf16.vlgmr.msra.gmra.mrb[16].mxu1 %v3737_v41  ;;  %v3579_v41 = vld [vmem:[%s5016_s2 + $0x88] sm:$0xff]  }
 0x33c   :  { %3221 = vmatprep.mubr.bf16.mxu1 %v3742_v42  ;;  %3235 = vmatprep.subr.bf16.mxu0 %v3579_v41  ;;  %v3580_v42 = vld [vmem:[%s5016_s2 + $0x90] sm:$0xff]  }
 0x33d   :  { %3236 = vmatpush3.bf16.msra.mxu0 %v3579_v41 }
 0x33e   :  { %3237 = vmatprep.subr.bf16.mxu0 %v3580_v42 }
 0x341   :  { %3238 = vmatpush3.bf16.msra.mxu0 %v3580_v42 }
 0x343   :  { %3222 = vmatmul.mubr.bf16.gmra.mrb[20].mxu1 %v3749_v43  ;;  %v3582_v43 = vld [vmem:[%s5016_s2 + $0xa0] sm:$0xff]  }
 0x344   :  { %3225 = vmatprep.mubr.bf16.mxu1 %v3754_v44  ;;  %v3583_v44 = vld [vmem:[%s5016_s2 + $0xa8] sm:$0xff]  }
 0x34b   :  { %3226 = vmatmul.mubr.bf16.gmra.mrb[24].mxu1 %v3761_v45  ;;  %v3584_v45 = vld [vmem:[%s5016_s2 + $0xb0] sm:$0xff]  }
 0x34c   :  { %3229 = vmatprep.mubr.bf16.mxu1 %v3766_v46  ;;  %v3585_v46 = vld [vmem:[%s5016_s2 + $0xb8] sm:$0xff]  }
 0x353   :  { %3230 = vmatmul.mubr.bf16.gmra.mrb[28].mxu1 %v3773_v47  ;;  %v4033_v47 = vld [vmem:[%s5019_s3 + $0x1] ss:$0 sm:$0xff] }
 0x354   :  { %3281 = vmatprep.mubr.bf16.mxu1 %v3731_v16  ;;  %v3581_v16 = vld [vmem:[%s5016_s2 + $0x98] sm:$0xff]  }
 0x355   :  { %3239 = vmatprep.subr.bf16.mxu0 %v3581_v16 }
 0x356   :  { %3240 = vmatpush3.bf16.msra.mxu0 %v3581_v16 }
 0x357   :  { %3241 = vmatprep.subr.bf16.mxu0 %v3582_v43 }
 0x35a   :  { %3242 = vmatpush3.bf16.msra.mxu0 %v3582_v43 }
 0x35b   :  { %3243 = vmatprep.subr.bf16.mxu0 %v3583_v44 }
 0x35e   :  { %3244 = vmatpush3.bf16.msra.mxu0 %v3583_v44 }
 0x35f   :  { %3245 = vmatprep.subr.bf16.mxu0 %v3584_v45 }
 0x362   :  { %3246 = vmatpush3.bf16.msra.mxu0 %v3584_v45 }
 0x363   :  { %3247 = vmatprep.subr.bf16.mxu0 %v3585_v46 }
 0x366   :  { %3248 = vmatpush3.bf16.msra.mxu0 %v3585_v46 }
 0x40e   :  { %v3219_v20 = vpop.f32.mrb[16].mxu1 }
 0x40f   :  { %v919_v26 = vadd.f32 %v3219_v20, %v4033_v47  ;;  %v910_v32 = vpop.f32.mrb[17].mxu1 }
 0x410   :  { %v4037_v33 = vadd.f32 %v4033_v47, %v910_v32  ;;  %v3220_v56 = vpop.f32.mrb[18].mxu1 }
 0x411   :  { %v922_v34 = vadd.f32 %v3220_v56, %v4033_v47  ;;  %v913_v58 = vpop.f32.mrb[19].mxu1  ;;  %v4040_v35 = vmul.f32 0.0, %v919_v26 }
 0x412   :  { %v4043_v19 = vadd.f32 %v4033_v47, %v913_v58  ;;  %v1011_v36 = vmul.f32 %v4037_v33, %v4037_v33 }
 0x413   :  { %v4045_v23 = vmul.f32 0.0, %v922_v34  ;;  %v1013_v39 = vmul.f32 %v4040_v35, %v4040_v35 }
 0x414   :  { %v989_v37 = vadd.f32 %v4043_v19, %v4037_v33  ;;  %v1012_v38 = vmul.f32 %v4043_v19, %v4043_v19 }
 0x415   :  { %v1014_v62 = vmul.f32 %v4045_v23, %v4045_v23 }
 0x416   :  { %v990_v40 = vadd.f32 %v989_v37, %v4040_v35  ;;  %v1027_v48 = vadd.f32 %v1012_v38, %v1011_v36  ;;  %v3223_v29 = vpop.f32.mrb[20].mxu1 }
 0x417   :  { %v926_v27 = vpop.f32.mrb[21].mxu1  ;;  %v935_v49 = vadd.f32 %v3223_v29, %v4033_v47 }
 0x418   :  { %v1028_v17 = vadd.f32 %v1027_v48, %v1013_v39  ;;  %v927_v51 = vadd.f32 %v4033_v47, %v926_v27  ;;  %v991_v52 = vadd.f32 %v990_v40, %v4045_v23  ;;  %v3224_v54 = vpop.f32.mrb[22].mxu1 }
 0x419   :  { %v938_v55 = vadd.f32 %v3224_v54, %v4033_v47  ;;  %v929_v57 = vpop.f32.mrb[23].mxu1  ;;  %v4065_v53 = vmul.f32 0.0, %v935_v49 }
 0x41a   :  { %v4062_v61 = vmul.f32 0.0, %v927_v51  ;;  %v1029_v63 = vadd.f32 %v1028_v17, %v1014_v62  ;;  %v930_v3 = vadd.f32 %v4033_v47, %v929_v57 }
 0x41b   :  { %v4072_v7 = vmul.f32 0.0, %v938_v55  ;;  %v1017_v13 = vmul.f32 %v4065_v53, %v4065_v53 }
 0x41c   :  { %v992_v4 = vadd.f32 %v991_v52, %v4062_v61  ;;  %v1015_v5 = vmul.f32 %v4062_v61, %v4062_v61  ;;  %v4070_v6 = vmul.f32 0.0, %v930_v3 }
 0x41d   :  { %v1018_v15 = vmul.f32 %v4072_v7, %v4072_v7 }
 0x41e   :  { %v1030_v21 = vadd.f32 %v1029_v63, %v1015_v5  ;;  %v993_v8 = vadd.f32 %v992_v4, %v4070_v6  ;;  %v1016_v9 = vmul.f32 %v4070_v6, %v4070_v6  ;;  %v3227_v10 = vpop.f32.mrb[24].mxu1 }
 0x41f   :  { %v951_v11 = vadd.f32 %v3227_v10, %v4033_v47  ;;  %v942_v12 = vpop.f32.mrb[25].mxu1 }
 0x420   :  { %v994_v60 = vadd.f32 %v993_v8, %v4065_v53  ;;  %v1031_v14 = vadd.f32 %v1030_v21, %v1016_v9  ;;  %v943_v50 = vadd.f32 %v4033_v47, %v942_v12  ;;  %v3228_v59 = vpop.f32.mrb[26].mxu1 }
 0x421   :  { %v954_v18 = vadd.f32 %v3228_v59, %v4033_v47  ;;  %v945_v22 = vpop.f32.mrb[27].mxu1  ;;  %v4089_v30 = vmul.f32 0.0, %v951_v11 }
 0x422   :  { %v1032_v24 = vadd.f32 %v1031_v14, %v1017_v13  ;;  %v4085_v25 = vmul.f32 0.0, %v943_v50  ;;  %v995_v1 = vadd.f32 %v994_v60, %v4072_v7  ;;  %v946_v28 = vadd.f32 %v4033_v47, %v945_v22 }
 0x423   :  { %v4096_v42 = vmul.f32 0.0, %v954_v18  ;;  %v1021_v26 = vmul.f32 %v4089_v30, %v4089_v30 }
 0x424   :  { %v996_v0 = vadd.f32 %v995_v1, %v4085_v25  ;;  %v1019_v31 = vmul.f32 %v4085_v25, %v4085_v25  ;;  %v1033_v2 = vadd.f32 %v1032_v24, %v1018_v15  ;;  %v4094_v41 = vmul.f32 0.0, %v946_v28 }
 0x425   :  { %v1022_v36 = vmul.f32 %v4096_v42, %v4096_v42 }
 0x426   :  { %v1034_v16 = vadd.f32 %v1033_v2, %v1019_v31  ;;  %v997_v43 = vadd.f32 %v996_v0, %v4094_v41  ;;  %v1020_v44 = vmul.f32 %v4094_v41, %v4094_v41  ;;  %v3231_v45 = vpop.f32.mrb[28].mxu1 }
 0x427   :  { %v967_v46 = vadd.f32 %v3231_v45, %v4033_v47  ;;  %v958_v20 = vpop.f32.mrb[29].mxu1 }
 0x428   :  { %v998_v32 = vadd.f32 %v997_v43, %v4089_v30  ;;  %v1035_v56 = vadd.f32 %v1034_v16, %v1020_v44  ;;  %v959_v34 = vadd.f32 %v4033_v47, %v958_v20  ;;  %v3232_v58 = vpop.f32.mrb[30].mxu1 }
 0x429   :  { %v970_v37 = vadd.f32 %v3232_v58, %v4033_v47  ;;  %v961_v38 = vpop.f32.mrb[31].mxu1  ;;  %v4113_v62 = vmul.f32 0.0, %v967_v46  ;;  %v4175_v58 = vld [vmem:[%s5021_s5 + $0x1] ss:$0 sm:$0xff] }
 0x42a   :  { %v1036_v39 = vadd.f32 %v1035_v56, %v1021_v26  ;;  %v4109_v40 = vmul.f32 0.0, %v959_v34  ;;  %v999_v48 = vadd.f32 %v998_v32, %v4096_v42  ;;  %v962_v29 = vadd.f32 %v4033_v47, %v961_v38 }
 0x42b   :  { %v4118_v54 = vmul.f32 0.0, %v970_v37  ;;  %v1025_v63 = vmul.f32 %v4113_v62, %v4113_v62 }
 0x42c   :  { %v1000_v27 = vadd.f32 %v999_v48, %v4109_v40  ;;  %v1023_v17 = vmul.f32 %v4109_v40, %v4109_v40  ;;  %v1037_v49 = vadd.f32 %v1036_v39, %v1022_v36  ;;  %v986_v51 = vmul.f32 0.0, %v962_v29 }
 0x42d   :  { %v1026_v4 = vmul.f32 %v4118_v54, %v4118_v54 }
 0x42e   :  { %v1038_v52 = vadd.f32 %v1037_v49, %v1023_v17  ;;  %v1001_v55 = vadd.f32 %v1000_v27, %v986_v51  ;;  %v1024_v57 = vmul.f32 %v986_v51, %v986_v51 }
 0x430   :  { %v1002_v3 = vadd.f32 %v1001_v55, %v4113_v62  ;;  %v1039_v47 = vadd.f32 %v1038_v52, %v1024_v57 }
 0x432   :  { %v1003_v5 = vadd.f32 %v1002_v3, %v4118_v54  ;;  %v1040_v21 = vadd.f32 %v1039_v47, %v1025_v63 }
 0x434   :  { %v1004_v8 = vrot.slane %v1003_v5, 4  ;;  %v1041_v9 = vadd.f32 %v1040_v21, %v1026_v4 }
 0x436   :  { %v1005_v10 = vadd.f32 %v1004_v8, %v1003_v5  ;;  %v1042_v11 = vrot.slane %v1041_v9, 4 }
 0x438   :  { %v1006_v12 = vrot.slane %v1005_v10, 2  ;;  %v1043_v13 = vadd.f32 %v1042_v11, %v1041_v9 }
 0x43a   :  { %v1007_v60 = vadd.f32 %v1006_v12, %v1005_v10  ;;  %v1044_v14 = vrot.slane %v1043_v13, 2 }
 0x43c   :  { %v1008_v50 = vrot.slane %v1007_v60, 1  ;;  %v1045_v59 = vadd.f32 %v1044_v14, %v1043_v13 }
 0x43e   :  { %v1009_v15 = vadd.f32 %v1008_v50, %v1007_v60  ;;  %v1046_v18 = vrot.slane %v1045_v59, 1 }
 0x440   :  { %v4126_v22 = vmul.f32 0.0625, %v1009_v15  ;;  %v1047_v24 = vadd.f32 %v1046_v18, %v1045_v59 }
 0x442   :  { %v1048_v1 = vmul.f32 0.0625, %v1047_v24  ;;  %v1049_v28 = vmul.f32 %v4126_v22, %v4126_v22  ;;  %v1065_v0 = vsub.f32 %v986_v51, %v4126_v22  ;;  %v1052_v31 = vsub.f32 %v4037_v33, %v4126_v22 }
 0x443   :  { %v1053_v2 = vsub.f32 %v4043_v19, %v4126_v22  ;;  %v1054_v16 = vsub.f32 %v4040_v35, %v4126_v22  ;;  %v1055_v43 = vsub.f32 %v4045_v23, %v4126_v22  ;;  %v1056_v44 = vsub.f32 %v4062_v61, %v4126_v22 }
 0x444   :  { %v1050_v45 = vsub.f32 %v1048_v1, %v1049_v28  ;;  %v1057_v46 = vsub.f32 %v4070_v6, %v4126_v22  ;;  %v1058_v20 = vsub.f32 %v4065_v53, %v4126_v22  ;;  %v1059_v33 = vsub.f32 %v4072_v7, %v4126_v22 }
 0x445   :  { %v1060_v19 = vsub.f32 %v4085_v25, %v4126_v22  ;;  %v1061_v35 = vsub.f32 %v4094_v41, %v4126_v22  ;;  %v1062_v23 = vsub.f32 %v4089_v30, %v4126_v22  ;;  %v1063_v61 = vsub.f32 %v4096_v42, %v4126_v22  ;;  %v4166_v30 = vld [vmem:[%s5020_s4 + $0x1] ss:$0 sm:$0xff] }
 0x446   :  { %v1051_v26 = vmax.f32 %v1050_v45, 0.0  ;;  %v1064_v6 = vsub.f32 %v4109_v40, %v4126_v22  ;;  %v1066_v53 = vsub.f32 %v4113_v62, %v4126_v22  ;;  %v1067_v7 = vsub.f32 %v4118_v54, %v4126_v22 }
 0x448   :  { %v1068_v25 = vadd.f32 1e-05, %v1051_v26 }
 0x44a   :  { %3604 = vrsqrt.f32 %v1068_v25 }
 0x454   :  { %v4161_v32 = vpop.eup %3604 }
 0x455   :  { %v1083_v41 = vmul.f32 %v4161_v32, %v1065_v0  ;;  %v1070_v42 = vmul.f32 %v4161_v32, %v1052_v31  ;;  %v1071_v56 = vmul.f32 %v4161_v32, %v1053_v2  ;;  %v1072_v34 = vmul.f32 %v4161_v32, %v1054_v16 }
 0x456   :  { %v1073_v36 = vmul.f32 %v4161_v32, %v1055_v43  ;;  %v1074_v37 = vmul.f32 %v4161_v32, %v1056_v44  ;;  %v1075_v38 = vmul.f32 %v4161_v32, %v1057_v46  ;;  %v1076_v39 = vmul.f32 %v4161_v32, %v1058_v20 }
 0x457   :  { %v1094_v40 = vmul.f32 %v4166_v30, %v1070_v42  ;;  %v1095_v48 = vmul.f32 %v4166_v30, %v1071_v56  ;;  %v1096_v29 = vmul.f32 %v4166_v30, %v1072_v34  ;;  %v1077_v27 = vmul.f32 %v4161_v32, %v1059_v33 }
 0x458   :  { %v1097_v17 = vmul.f32 %v4166_v30, %v1073_v36  ;;  %v1098_v49 = vmul.f32 %v4166_v30, %v1074_v37  ;;  %v1099_v51 = vmul.f32 %v4166_v30, %v1075_v38  ;;  %v1100_v52 = vmul.f32 %v4166_v30, %v1076_v39 }
 0x459   :  { %v1118_v55 = vadd.f32 %v4175_v58, %v1094_v40  ;;  %v1119_v57 = vadd.f32 %v4175_v58, %v1095_v48  ;;  %v1120_v63 = vadd.f32 %v4175_v58, %v1096_v29  ;;  %v1101_v3 = vmul.f32 %v4166_v30, %v1077_v27 }
 0x45a   :  { %v1121_v47 = vadd.f32 %v4175_v58, %v1097_v17  ;;  %v1122_v4 = vadd.f32 %v4175_v58, %v1098_v49  ;;  %v1123_v5 = vadd.f32 %v4175_v58, %v1099_v51  ;;  %v1124_v21 = vadd.f32 %v4175_v58, %v1100_v52 }
 0x45b   :  { %v1134_v8 = vmax.f32 %v1118_v55, 0.0  ;;  %v1135_v9 = vmax.f32 %v1119_v57, 0.0  ;;  %v1136_v10 = vmax.f32 %v1120_v63, 0.0  ;;  %v1125_v11 = vadd.f32 %v4175_v58, %v1101_v3 }
 0x45c   :  { %v1137_v12 = vmax.f32 %v1121_v47, 0.0  ;;  %v1138_v13 = vmax.f32 %v1122_v4, 0.0  ;;  %v1139_v60 = vmax.f32 %v1123_v5, 0.0  ;;  %v1140_v14 = vmax.f32 %v1124_v21, 0.0 }
 0x45d   :  { %v1166_v50 = vpack.c.bf16 %v1135_v9, %v1134_v8  ;;  %v1152_v59 = vmul.f32 0.0, %v1136_v10  ;;  %v1141_v15 = vmax.f32 %v1125_v11, 0.0  ;;  %v1078_v18 = vmul.f32 %v4161_v32, %v1060_v19 }
 0x45e   :  { %v1153_v24 = vmul.f32 0.0, %v1137_v12  ;;  %v1154_v1 = vmul.f32 0.0, %v1138_v13  ;;  %v1155_v28 = vmul.f32 0.0, %v1139_v60  ;;  %v1156_v0 = vmul.f32 0.0, %v1140_v14 }
 0x45f   :  { %3249 = vmatprep.mubr.bf16.mxu0 %v1166_v50  ;;  %v1157_v31 = vmul.f32 0.0, %v1141_v15  ;;  %v1079_v2 = vmul.f32 %v4161_v32, %v1061_v35  ;;  %v1102_v16 = vmul.f32 %v4166_v30, %v1078_v18  ;;  %v1080_v43 = vmul.f32 %v4161_v32, %v1062_v23 }
 0x460   :  { %v1167_v44 = vpack.c.bf16 %v1153_v24, %v1152_v59  ;;  %v1168_v45 = vpack.c.bf16 %v1155_v28, %v1154_v1  ;;  %v1081_v46 = vmul.f32 %v4161_v32, %v1063_v61  ;;  %v1082_v20 = vmul.f32 %v4161_v32, %v1064_v6 }
 0x461   :  { %v1169_v33 = vpack.c.bf16 %v1157_v31, %v1156_v0  ;;  %v1103_v19 = vmul.f32 %v4166_v30, %v1079_v2  ;;  %v1126_v26 = vadd.f32 %v4175_v58, %v1102_v16  ;;  %v1104_v25 = vmul.f32 %v4166_v30, %v1080_v43 }
 0x462   :  { %3250 = vmatmul.mubr.bf16.vlgmr.msra.gmra.mrb[32].mxu0 %v1167_v44  ;;  %v1105_v35 = vmul.f32 %v4166_v30, %v1081_v46  ;;  %v1106_v42 = vmul.f32 %v4166_v30, %v1082_v20  ;;  %v1107_v23 = vmul.f32 %v4166_v30, %v1083_v41  ;;  %v1084_v61 = vmul.f32 %v4161_v32, %v1066_v53  ;;  %v4230_v46 = vld [vmem:[%s5018_s0 + $0x8] sm:$0xff]   ;;  %v4236_v20 = vld [vmem:[%s5018_s0 + $0x10] sm:$0xff]  }
 0x463   :  { %3253 = vmatprep.mubr.bf16.mxu0 %v1168_v45  ;;  %v1127_v6 = vadd.f32 %v4175_v58, %v1103_v19  ;;  %v1142_v56 = vmax.f32 %v1126_v26, 0.0  ;;  %v1128_v34 = vadd.f32 %v4175_v58, %v1104_v25  ;;  %v1085_v36 = vmul.f32 %v4161_v32, %v1067_v7  ;;  %v4248_v19 = vld [vmem:[%s5018_s0 + $0x20] sm:$0xff]   ;;  %v4254_v26 = vld [vmem:[%s5018_s0 + $0x28] sm:$0xff]   ;;  %v4260_v25 = vld [vmem:[%s5018_s0 + $0x30] sm:$0xff]  }
 0x464   :  { %v1129_v37 = vadd.f32 %v4175_v58, %v1105_v35  ;;  %v1130_v41 = vadd.f32 %v4175_v58, %v1106_v42  ;;  %v1131_v38 = vadd.f32 %v4175_v58, %v1107_v23  ;;  %v1108_v62 = vmul.f32 %v4166_v30, %v1084_v61  ;;  %v4266_v35 = vld [vmem:[%s5018_s0 + $0x38] sm:$0xff]   ;;  %v4272_v42 = vld [vmem:[%s5018_s0] sm:$0xff]   ;;  %v3587_v61 = vld [vmem:[%s5016_s2 + $0xc8] sm:$0xff]  }
 0x465   :  { %v1143_v53 = vmax.f32 %v1127_v6, 0.0  ;;  %v1158_v39 = vmul.f32 0.0, %v1142_v56  ;;  %v1144_v40 = vmax.f32 %v1128_v34, 0.0  ;;  %v1109_v48 = vmul.f32 %v4166_v30, %v1085_v36  ;;  %v3586_v23 = vld [vmem:[%s5016_s2 + $0xc0] sm:$0xff]   ;;  %v3588_v6 = vld [vmem:[%s5016_s2 + $0xd0] sm:$0xff]   ;;  %v3589_v56 = vld [vmem:[%s5016_s2 + $0xd8] sm:$0xff]  }
 0x466   :  { %v1145_v29 = vmax.f32 %v1129_v37, 0.0  ;;  %v1146_v27 = vmax.f32 %v1130_v41, 0.0  ;;  %v1147_v17 = vmax.f32 %v1131_v38, 0.0  ;;  %v1132_v54 = vadd.f32 %v4175_v58, %v1108_v62  ;;  %3297 = vmatprep.subr.bf16.mxu0 %v3586_v23  ;;  %v3590_v34 = vld [vmem:[%s5016_s2 + $0xe0] sm:$0xff]   ;;  %v3591_v36 = vld [vmem:[%s5016_s2 + $0xe8] sm:$0xff]   ;;  %v3592_v37 = vld [vmem:[%s5016_s2 + $0xf0] sm:$0xff]  }
 0x467   :  { %v1159_v22 = vmul.f32 0.0, %v1143_v53  ;;  %v1160_v7 = vmul.f32 0.0, %v1144_v40  ;;  %v1133_v32 = vadd.f32 %v4175_v58, %v1109_v48  ;;  %3298 = vmatpush3.bf16.msra.mxu0 %v3586_v23  ;;  %v3593_v41 = vld [vmem:[%s5016_s2 + $0xf8] sm:$0xff]   ;;  %v4302_v38 = vld [vmem:[%s5019_s3 + $0x2] ss:$0 sm:$0xff] }
 0x468   :  { %v1161_v49 = vmul.f32 0.0, %v1145_v29  ;;  %v1162_v51 = vmul.f32 0.0, %v1146_v27  ;;  %v1163_v52 = vmul.f32 0.0, %v1147_v17  ;;  %v1148_v55 = vmax.f32 %v1132_v54, 0.0  ;;  %3299 = vmatprep.subr.bf16.mxu0 %v3587_v61 }
 0x469   :  { %v1170_v57 = vpack.c.bf16 %v1159_v22, %v1158_v39  ;;  %v1149_v63 = vmax.f32 %v1133_v32, 0.0 }
 0x46a   :  { %3254 = vmatmul.mubr.bf16.gmra.mrb[36].mxu0 %v1169_v33  ;;  %v1171_v3 = vpack.c.bf16 %v1161_v49, %v1160_v7  ;;  %v1172_v47 = vpack.c.bf16 %v1163_v52, %v1162_v51  ;;  %v1164_v4 = vmul.f32 0.0, %v1148_v55  ;;  %v4242_v33 = vld [vmem:[%s5018_s0 + $0x18] sm:$0xff]  }
 0x46b   :  { %3257 = vmatprep.mubr.bf16.mxu0 %v1170_v57  ;;  %v1165_v30 = vmul.f32 0.0, %v1149_v63  ;;  %3300 = vmatpush3.bf16.msra.mxu0 %v3587_v61 }
 0x46c   :  { %3301 = vmatprep.subr.bf16.mxu0 %v3588_v6 }
 0x46d   :  { %v1173_v5 = vpack.c.bf16 %v1165_v30, %v1164_v4 }
 0x46f   :  { %3302 = vmatpush3.bf16.msra.mxu0 %v3588_v6 }
 0x470   :  { %3303 = vmatprep.subr.bf16.mxu0 %v3589_v56 }
 0x472   :  { %3258 = vmatmul.mubr.bf16.gmra.mrb[40].mxu0 %v1171_v3 }
 0x473   :  { %3261 = vmatprep.mubr.bf16.mxu0 %v1172_v47  ;;  %3304 = vmatpush3.bf16.msra.mxu0 %v3589_v56 }
 0x474   :  { %3305 = vmatprep.subr.bf16.mxu0 %v3590_v34 }
 0x477   :  { %3306 = vmatpush3.bf16.msra.mxu0 %v3590_v34 }
 0x478   :  { %3307 = vmatprep.subr.bf16.mxu0 %v3591_v36 }
 0x47a   :  { %3262 = vmatmul.mubr.bf16.gmra.mrb[44].mxu0 %v1173_v5 }
 0x47b   :  { %3308 = vmatpush3.bf16.msra.mxu0 %v3591_v36 }
 0x47c   :  { %3309 = vmatprep.subr.bf16.mxu0 %v3592_v37 }
 0x47f   :  { %3310 = vmatpush3.bf16.msra.mxu0 %v3592_v37 }
 0x480   :  { %3311 = vmatprep.subr.bf16.mxu0 %v3593_v41 }
 0x483   :  { %3312 = vmatpush3.bf16.msra.mxu0 %v3593_v41 }
 0x535   :  { %v3251_v21 = vpop.f32.mrb[32].mxu0 }
 0x536   :  { %v1273_v8 = vpop.f32.mrb[33].mxu0 }
 0x537   :  { %v3252_v9 = vpop.f32.mrb[34].mxu0 }
 0x538   :  { %v1337_v58 = vpack.c.bf16 %v3252_v9, %v3251_v21  ;;  %v1276_v10 = vpop.f32.mrb[35].mxu0 }
 0x539   :  { %v1336_v11 = vpack.c.bf16 %v1276_v10, %v1273_v8 }
 0x53b   :  { %3265 = vmatprep.subr.bf16.mxu1 %v1336_v11 }
 0x53c   :  { %3266 = vmatpush3.bf16.msra.mxu1 %v1336_v11 }
 0x53d   :  { %v3255_v12 = vpop.f32.mrb[36].mxu0  ;;  %3267 = vmatprep.subr.bf16.mxu1 %v1337_v58 }
 0x53e   :  { %v1289_v13 = vpop.f32.mrb[37].mxu0 }
 0x53f   :  { %v3256_v60 = vpop.f32.mrb[38].mxu0 }
 0x540   :  { %v1339_v14 = vpack.c.bf16 %v3256_v60, %v3255_v12  ;;  %v1292_v50 = vpop.f32.mrb[39].mxu0  ;;  %3268 = vmatpush3.bf16.msra.mxu1 %v1337_v58 }
 0x541   :  { %v1338_v59 = vpack.c.bf16 %v1292_v50, %v1289_v13 }
 0x543   :  { %3269 = vmatprep.subr.bf16.mxu1 %v1338_v59 }
 0x544   :  { %3270 = vmatpush3.bf16.msra.mxu1 %v1338_v59 }
 0x545   :  { %v3259_v15 = vpop.f32.mrb[40].mxu0  ;;  %3271 = vmatprep.subr.bf16.mxu1 %v1339_v14 }
 0x546   :  { %v1305_v18 = vpop.f32.mrb[41].mxu0 }
 0x547   :  { %v3260_v24 = vpop.f32.mrb[42].mxu0 }
 0x548   :  { %v1341_v1 = vpack.c.bf16 %v3260_v24, %v3259_v15  ;;  %v1308_v28 = vpop.f32.mrb[43].mxu0  ;;  %3272 = vmatpush3.bf16.msra.mxu1 %v1339_v14 }
 0x549   :  { %v1340_v0 = vpack.c.bf16 %v1308_v28, %v1305_v18 }
 0x54b   :  { %3273 = vmatprep.subr.bf16.mxu1 %v1340_v0 }
 0x54c   :  { %3274 = vmatpush3.bf16.msra.mxu1 %v1340_v0 }
 0x54d   :  { %v3263_v31 = vpop.f32.mrb[44].mxu0  ;;  %3275 = vmatprep.subr.bf16.mxu1 %v1341_v1 }
 0x54e   :  { %v1321_v2 = vpop.f32.mrb[45].mxu0 }
 0x54f   :  { %v3264_v16 = vpop.f32.mrb[46].mxu0 }
 0x550   :  { %v1343_v43 = vpack.c.bf16 %v3264_v16, %v3263_v31  ;;  %v1324_v44 = vpop.f32.mrb[47].mxu0  ;;  %3276 = vmatpush3.bf16.msra.mxu1 %v1341_v1 }
 0x551   :  { %v1342_v45 = vpack.c.bf16 %v1324_v44, %v1321_v2 }
 0x553   :  { %3277 = vmatprep.subr.bf16.mxu1 %v1342_v45 }
 0x554   :  { %3278 = vmatpush3.bf16.msra.mxu1 %v1342_v45 }
 0x555   :  { %3279 = vmatprep.subr.bf16.mxu1 %v1343_v43 }
 0x558   :  { %3280 = vmatpush3.bf16.msra.mxu1 %v1343_v43 }
 0x55b   :  { %3282 = vmatmul.mubr.bf16.vlgmr.msra.gmra.mrb[32].mxu1 %v4230_v46 }
 0x55c   :  { %3285 = vmatprep.mubr.bf16.mxu1 %v4236_v20 }
 0x563   :  { %3286 = vmatmul.mubr.bf16.gmra.mrb[36].mxu1 %v4242_v33 }
 0x564   :  { %3289 = vmatprep.mubr.bf16.mxu1 %v4248_v19 }
 0x56b   :  { %3290 = vmatmul.mubr.bf16.gmra.mrb[40].mxu1 %v4254_v26 }
 0x56c   :  { %3293 = vmatprep.mubr.bf16.mxu1 %v4260_v25 }
 0x573   :  { %3294 = vmatmul.mubr.bf16.gmra.mrb[44].mxu1 %v4266_v35 }
 0x574   :  { %3345 = vmatprep.mubr.bf16.mxu1 %v4272_v42 }
 0x62e   :  { %v3283_v62 = vpop.f32.mrb[32].mxu1 }
 0x62f   :  { %v1395_v53 = vadd.f32 %v3283_v62, %v4302_v38  ;;  %v1386_v39 = vpop.f32.mrb[33].mxu1 }
 0x630   :  { %v4306_v40 = vadd.f32 %v4302_v38, %v1386_v39  ;;  %v3284_v48 = vpop.f32.mrb[34].mxu1 }
 0x631   :  { %v1398_v29 = vadd.f32 %v3284_v48, %v4302_v38  ;;  %v1389_v27 = vpop.f32.mrb[35].mxu1  ;;  %v4309_v17 = vmul.f32 0.0, %v1395_v53 }
 0x632   :  { %v4312_v54 = vadd.f32 %v4302_v38, %v1389_v27  ;;  %v1487_v7 = vmul.f32 %v4306_v40, %v4306_v40 }
 0x633   :  { %v4314_v22 = vmul.f32 0.0, %v1398_v29  ;;  %v1489_v51 = vmul.f32 %v4309_v17, %v4309_v17 }
 0x634   :  { %v1465_v32 = vadd.f32 %v4312_v54, %v4306_v40  ;;  %v1488_v49 = vmul.f32 %v4312_v54, %v4312_v54 }
 0x635   :  { %v1490_v63 = vmul.f32 %v4314_v22, %v4314_v22 }
 0x636   :  { %v1466_v52 = vadd.f32 %v1465_v32, %v4309_v17  ;;  %v1503_v55 = vadd.f32 %v1488_v49, %v1487_v7  ;;  %v3287_v57 = vpop.f32.mrb[36].mxu1 }
 0x637   :  { %v1402_v3 = vpop.f32.mrb[37].mxu1  ;;  %v1411_v4 = vadd.f32 %v3287_v57, %v4302_v38 }
 0x638   :  { %v1504_v47 = vadd.f32 %v1503_v55, %v1489_v51  ;;  %v1403_v30 = vadd.f32 %v4302_v38, %v1402_v3  ;;  %v1467_v5 = vadd.f32 %v1466_v52, %v4314_v22  ;;  %v3288_v21 = vpop.f32.mrb[38].mxu1 }
 0x639   :  { %v1414_v8 = vadd.f32 %v3288_v21, %v4302_v38  ;;  %v1405_v9 = vpop.f32.mrb[39].mxu1  ;;  %v4334_v12 = vmul.f32 0.0, %v1411_v4 }
 0x63a   :  { %v4331_v58 = vmul.f32 0.0, %v1403_v30  ;;  %v1505_v10 = vadd.f32 %v1504_v47, %v1490_v63  ;;  %v1406_v11 = vadd.f32 %v4302_v38, %v1405_v9 }
 0x63b   :  { %v4341_v50 = vmul.f32 0.0, %v1414_v8  ;;  %v1493_v0 = vmul.f32 %v4334_v12, %v4334_v12 }
 0x63c   :  { %v1468_v13 = vadd.f32 %v1467_v5, %v4331_v58  ;;  %v1491_v60 = vmul.f32 %v4331_v58, %v4331_v58  ;;  %v4339_v14 = vmul.f32 0.0, %v1406_v11 }
 0x63d   :  { %v1494_v44 = vmul.f32 %v4341_v50, %v4341_v50 }
 0x63e   :  { %v1506_v59 = vadd.f32 %v1505_v10, %v1491_v60  ;;  %v1469_v15 = vadd.f32 %v1468_v13, %v4339_v14  ;;  %v1492_v18 = vmul.f32 %v4339_v14, %v4339_v14  ;;  %v3291_v24 = vpop.f32.mrb[40].mxu1 }
 0x63f   :  { %v1427_v1 = vadd.f32 %v3291_v24, %v4302_v38  ;;  %v1418_v28 = vpop.f32.mrb[41].mxu1 }
 0x640   :  { %v1470_v31 = vadd.f32 %v1469_v15, %v4334_v12  ;;  %v1507_v2 = vadd.f32 %v1506_v59, %v1492_v18  ;;  %v1419_v16 = vadd.f32 %v4302_v38, %v1418_v28  ;;  %v3292_v43 = vpop.f32.mrb[42].mxu1 }
 0x641   :  { %v1430_v45 = vadd.f32 %v3292_v43, %v4302_v38  ;;  %v1421_v23 = vpop.f32.mrb[43].mxu1  ;;  %v4358_v36 = vmul.f32 0.0, %v1427_v1 }
 0x642   :  { %v1508_v61 = vadd.f32 %v1507_v2, %v1493_v0  ;;  %v4354_v6 = vmul.f32 0.0, %v1419_v16  ;;  %v1471_v56 = vadd.f32 %v1470_v31, %v4341_v50  ;;  %v1422_v34 = vadd.f32 %v4302_v38, %v1421_v23 }
 0x643   :  { %v4365_v39 = vmul.f32 0.0, %v1430_v45  ;;  %v1497_v51 = vmul.f32 %v4358_v36, %v4358_v36 }
 0x644   :  { %v1472_v37 = vadd.f32 %v1471_v56, %v4354_v6  ;;  %v1495_v41 = vmul.f32 %v4354_v6, %v4354_v6  ;;  %v1509_v62 = vadd.f32 %v1508_v61, %v1494_v44  ;;  %v4363_v53 = vmul.f32 0.0, %v1422_v34 }
 0x645   :  { %v1498_v3 = vmul.f32 %v4365_v39, %v4365_v39 }
 0x646   :  { %v1510_v48 = vadd.f32 %v1509_v62, %v1495_v41  ;;  %v1473_v29 = vadd.f32 %v1472_v37, %v4363_v53  ;;  %v1496_v27 = vmul.f32 %v4363_v53, %v4363_v53  ;;  %v3295_v7 = vpop.f32.mrb[44].mxu1 }
 0x647   :  { %v1443_v32 = vadd.f32 %v3295_v7, %v4302_v38  ;;  %v1434_v49 = vpop.f32.mrb[45].mxu1 }
 0x648   :  { %v1474_v52 = vadd.f32 %v1473_v29, %v4358_v36  ;;  %v1511_v55 = vadd.f32 %v1510_v48, %v1496_v27  ;;  %v1435_v57 = vadd.f32 %v4302_v38, %v1434_v49  ;;  %v3296_v63 = vpop.f32.mrb[46].mxu1 }
 0x649   :  { %v1446_v47 = vadd.f32 %v3296_v63, %v4302_v38  ;;  %v1437_v4 = vpop.f32.mrb[47].mxu1  ;;  %v4382_v9 = vmul.f32 0.0, %v1443_v32 }
 0x64a   :  { %v1512_v30 = vadd.f32 %v1511_v55, %v1497_v51  ;;  %v4378_v5 = vmul.f32 0.0, %v1435_v57  ;;  %v1475_v21 = vadd.f32 %v1474_v52, %v4365_v39  ;;  %v1438_v8 = vadd.f32 %v4302_v38, %v1437_v4 }
 0x64b   :  { %v4387_v15 = vmul.f32 0.0, %v1446_v47  ;;  %v1501_v1 = vmul.f32 %v4382_v9, %v4382_v9 }
 0x64c   :  { %v1476_v10 = vadd.f32 %v1475_v21, %v4378_v5  ;;  %v1499_v11 = vmul.f32 %v4378_v5, %v4378_v5  ;;  %v1513_v13 = vadd.f32 %v1512_v30, %v1498_v3  ;;  %v1462_v60 = vmul.f32 0.0, %v1438_v8 }
 0x64d   :  { %v1502_v0 = vmul.f32 %v4387_v15, %v4387_v15 }
 0x64e   :  { %v1514_v59 = vadd.f32 %v1513_v13, %v1499_v11  ;;  %v1477_v18 = vadd.f32 %v1476_v10, %v1462_v60  ;;  %v1500_v24 = vmul.f32 %v1462_v60, %v1462_v60  ;;  %v4444_v10 = vld [vmem:[%s5021_s5 + $0x2] ss:$0 sm:$0xff] }
 0x650   :  { %v1478_v28 = vadd.f32 %v1477_v18, %v4382_v9  ;;  %v1515_v38 = vadd.f32 %v1514_v59, %v1500_v24 }
 0x652   :  { %v1479_v31 = vadd.f32 %v1478_v28, %v4387_v15  ;;  %v1516_v2 = vadd.f32 %v1515_v38, %v1501_v1 }
 0x654   :  { %v1480_v16 = vrot.slane %v1479_v31, 4  ;;  %v1517_v43 = vadd.f32 %v1516_v2, %v1502_v0 }
 0x656   :  { %v1481_v44 = vadd.f32 %v1480_v16, %v1479_v31  ;;  %v1518_v45 = vrot.slane %v1517_v43, 4 }
 0x658   :  { %v1482_v23 = vrot.slane %v1481_v44, 2  ;;  %v1519_v61 = vadd.f32 %v1518_v45, %v1517_v43 }
 0x65a   :  { %v1483_v56 = vadd.f32 %v1482_v23, %v1481_v44  ;;  %v1520_v34 = vrot.slane %v1519_v61, 2 }
 0x65c   :  { %v1484_v37 = vrot.slane %v1483_v56, 1  ;;  %v1521_v41 = vadd.f32 %v1520_v34, %v1519_v61 }
 0x65e   :  { %v1485_v62 = vadd.f32 %v1484_v37, %v1483_v56  ;;  %v1522_v48 = vrot.slane %v1521_v41, 1 }
 0x660   :  { %v4395_v29 = vmul.f32 0.0625, %v1485_v62  ;;  %v1523_v27 = vadd.f32 %v1522_v48, %v1521_v41 }
 0x662   :  { %v1524_v7 = vmul.f32 0.0625, %v1523_v27  ;;  %v1525_v32 = vmul.f32 %v4395_v29, %v4395_v29  ;;  %v1541_v49 = vsub.f32 %v1462_v60, %v4395_v29  ;;  %v1528_v51 = vsub.f32 %v4306_v40, %v4395_v29 }
 0x663   :  { %v1529_v52 = vsub.f32 %v4312_v54, %v4395_v29  ;;  %v1530_v55 = vsub.f32 %v4309_v17, %v4395_v29  ;;  %v1531_v57 = vsub.f32 %v4314_v22, %v4395_v29  ;;  %v1532_v63 = vsub.f32 %v4331_v58, %v4395_v29 }
 0x664   :  { %v1526_v3 = vsub.f32 %v1524_v7, %v1525_v32  ;;  %v1533_v47 = vsub.f32 %v4339_v14, %v4395_v29  ;;  %v1534_v4 = vsub.f32 %v4334_v12, %v4395_v29  ;;  %v1535_v40 = vsub.f32 %v4341_v50, %v4395_v29 }
 0x665   :  { %v1536_v54 = vsub.f32 %v4354_v6, %v4395_v29  ;;  %v1537_v17 = vsub.f32 %v4363_v53, %v4395_v29  ;;  %v1538_v22 = vsub.f32 %v4358_v36, %v4395_v29  ;;  %v1539_v58 = vsub.f32 %v4365_v39, %v4395_v29  ;;  %v4435_v36 = vld [vmem:[%s5020_s4 + $0x2] ss:$0 sm:$0xff] }
 0x666   :  { %v1527_v30 = vmax.f32 %v1526_v3, 0.0  ;;  %v1540_v14 = vsub.f32 %v4378_v5, %v4395_v29  ;;  %v1542_v12 = vsub.f32 %v4382_v9, %v4395_v29  ;;  %v1543_v50 = vsub.f32 %v4387_v15, %v4395_v29 }
 0x668   :  { %v1544_v6 = vadd.f32 1e-05, %v1527_v30 }
 0x66a   :  { %3606 = vrsqrt.f32 %v1544_v6 }
 0x674   :  { %v4430_v21 = vpop.eup %3606 }
 0x675   :  { %v1559_v53 = vmul.f32 %v4430_v21, %v1541_v49  ;;  %v1546_v39 = vmul.f32 %v4430_v21, %v1528_v51  ;;  %v1547_v5 = vmul.f32 %v4430_v21, %v1529_v52  ;;  %v1548_v8 = vmul.f32 %v4430_v21, %v1530_v55 }
 0x676   :  { %v1549_v11 = vmul.f32 %v4430_v21, %v1531_v57  ;;  %v1550_v13 = vmul.f32 %v4430_v21, %v1532_v63  ;;  %v1551_v60 = vmul.f32 %v4430_v21, %v1533_v47  ;;  %v1552_v59 = vmul.f32 %v4430_v21, %v1534_v4 }
 0x677   :  { %v1570_v18 = vmul.f32 %v4435_v36, %v1546_v39  ;;  %v1571_v24 = vmul.f32 %v4435_v36, %v1547_v5  ;;  %v1572_v1 = vmul.f32 %v4435_v36, %v1548_v8  ;;  %v1553_v28 = vmul.f32 %v4430_v21, %v1535_v40 }
 0x678   :  { %v1573_v38 = vmul.f32 %v4435_v36, %v1549_v11  ;;  %v1574_v0 = vmul.f32 %v4435_v36, %v1550_v13  ;;  %v1575_v31 = vmul.f32 %v4435_v36, %v1551_v60  ;;  %v1576_v2 = vmul.f32 %v4435_v36, %v1552_v59 }
 0x679   :  { %v1594_v16 = vadd.f32 %v4444_v10, %v1570_v18  ;;  %v1595_v43 = vadd.f32 %v4444_v10, %v1571_v24  ;;  %v1596_v44 = vadd.f32 %v4444_v10, %v1572_v1  ;;  %v1577_v45 = vmul.f32 %v4435_v36, %v1553_v28 }
 0x67a   :  { %v1597_v23 = vadd.f32 %v4444_v10, %v1573_v38  ;;  %v1598_v61 = vadd.f32 %v4444_v10, %v1574_v0  ;;  %v1599_v56 = vadd.f32 %v4444_v10, %v1575_v31  ;;  %v1600_v34 = vadd.f32 %v4444_v10, %v1576_v2 }
 0x67b   :  { %v1610_v37 = vmax.f32 %v1594_v16, 0.0  ;;  %v1611_v41 = vmax.f32 %v1595_v43, 0.0  ;;  %v1612_v62 = vmax.f32 %v1596_v44, 0.0  ;;  %v1601_v48 = vadd.f32 %v4444_v10, %v1577_v45 }
 0x67c   :  { %v1613_v27 = vmax.f32 %v1597_v23, 0.0  ;;  %v1614_v7 = vmax.f32 %v1598_v61, 0.0  ;;  %v1615_v32 = vmax.f32 %v1599_v56, 0.0  ;;  %v1616_v49 = vmax.f32 %v1600_v34, 0.0 }
 0x67d   :  { %v1642_v51 = vpack.c.bf16 %v1611_v41, %v1610_v37  ;;  %v1628_v52 = vmul.f32 0.0, %v1612_v62  ;;  %v1617_v55 = vmax.f32 %v1601_v48, 0.0  ;;  %v1554_v57 = vmul.f32 %v4430_v21, %v1536_v54 }
 0x67e   :  { %v1629_v63 = vmul.f32 0.0, %v1613_v27  ;;  %v1630_v3 = vmul.f32 0.0, %v1614_v7  ;;  %v1631_v47 = vmul.f32 0.0, %v1615_v32  ;;  %v1632_v4 = vmul.f32 0.0, %v1616_v49 }
 0x67f   :  { %3313 = vmatprep.mubr.bf16.mxu0 %v1642_v51  ;;  %v1633_v40 = vmul.f32 0.0, %v1617_v55  ;;  %v1555_v30 = vmul.f32 %v4430_v21, %v1537_v17  ;;  %v1578_v6 = vmul.f32 %v4435_v36, %v1554_v57  ;;  %v1556_v39 = vmul.f32 %v4430_v21, %v1538_v22 }
 0x680   :  { %v1643_v5 = vpack.c.bf16 %v1629_v63, %v1628_v52  ;;  %v1644_v8 = vpack.c.bf16 %v1631_v47, %v1630_v3  ;;  %v1557_v11 = vmul.f32 %v4430_v21, %v1539_v58  ;;  %v1558_v13 = vmul.f32 %v4430_v21, %v1540_v14 }
 0x681   :  { %v1645_v60 = vpack.c.bf16 %v1633_v40, %v1632_v4  ;;  %v1579_v54 = vmul.f32 %v4435_v36, %v1555_v30  ;;  %v1602_v59 = vadd.f32 %v4444_v10, %v1578_v6  ;;  %v1580_v18 = vmul.f32 %v4435_v36, %v1556_v39 }
 0x682   :  { %3314 = vmatmul.mubr.bf16.vlgmr.msra.gmra.mrb[48].mxu0 %v1643_v5  ;;  %v1581_v17 = vmul.f32 %v4435_v36, %v1557_v11  ;;  %v1582_v24 = vmul.f32 %v4435_v36, %v1558_v13  ;;  %v1583_v22 = vmul.f32 %v4435_v36, %v1559_v53  ;;  %v1560_v58 = vmul.f32 %v4430_v21, %v1542_v12 }
 0x683   :  { %3317 = vmatprep.mubr.bf16.mxu0 %v1644_v8  ;;  %v1603_v14 = vadd.f32 %v4444_v10, %v1579_v54  ;;  %v1618_v1 = vmax.f32 %v1602_v59, 0.0  ;;  %v1604_v28 = vadd.f32 %v4444_v10, %v1580_v18  ;;  %v1561_v38 = vmul.f32 %v4430_v21, %v1543_v50 }
 0x684   :  { %v1605_v0 = vadd.f32 %v4444_v10, %v1581_v17  ;;  %v1606_v53 = vadd.f32 %v4444_v10, %v1582_v24  ;;  %v1607_v31 = vadd.f32 %v4444_v10, %v1583_v22  ;;  %v1584_v9 = vmul.f32 %v4435_v36, %v1560_v58  ;;  %v3594_v22 = vld [vmem:[%s5016_s2 + $0x100] sm:$0xff]  }
 0x685   :  { %v1619_v12 = vmax.f32 %v1603_v14, 0.0  ;;  %v1634_v2 = vmul.f32 0.0, %v1618_v1  ;;  %v1620_v16 = vmax.f32 %v1604_v28, 0.0  ;;  %v1585_v43 = vmul.f32 %v4435_v36, %v1561_v38  ;;  %3361 = vmatprep.subr.bf16.mxu0 %v3594_v22 }
 0x686   :  { %v1621_v44 = vmax.f32 %v1605_v0, 0.0  ;;  %v1622_v45 = vmax.f32 %v1606_v53, 0.0  ;;  %v1623_v23 = vmax.f32 %v1607_v31, 0.0  ;;  %v1608_v15 = vadd.f32 %v4444_v10, %v1584_v9  ;;  %3362 = vmatpush3.bf16.msra.mxu0 %v3594_v22 }
 0x687   :  { %v1635_v29 = vmul.f32 0.0, %v1619_v12  ;;  %v1636_v50 = vmul.f32 0.0, %v1620_v16  ;;  %v1609_v21 = vadd.f32 %v4444_v10, %v1585_v43 }
 0x688   :  { %v1637_v61 = vmul.f32 0.0, %v1621_v44  ;;  %v1638_v56 = vmul.f32 0.0, %v1622_v45  ;;  %v1639_v34 = vmul.f32 0.0, %v1623_v23  ;;  %v1624_v37 = vmax.f32 %v1608_v15, 0.0 }
 0x689   :  { %v1646_v41 = vpack.c.bf16 %v1635_v29, %v1634_v2  ;;  %v1625_v62 = vmax.f32 %v1609_v21, 0.0 }
 0x68a   :  { %3318 = vmatmul.mubr.bf16.gmra.mrb[52].mxu0 %v1645_v60  ;;  %v1647_v48 = vpack.c.bf16 %v1637_v61, %v1636_v50  ;;  %v1648_v27 = vpack.c.bf16 %v1639_v34, %v1638_v56  ;;  %v1640_v7 = vmul.f32 0.0, %v1624_v37 }
 0x68b   :  { %3321 = vmatprep.mubr.bf16.mxu0 %v1646_v41  ;;  %v1641_v36 = vmul.f32 0.0, %v1625_v62 }
 0x68d   :  { %v1649_v32 = vpack.c.bf16 %v1641_v36, %v1640_v7 }
 0x692   :  { %3322 = vmatmul.mubr.bf16.gmra.mrb[56].mxu0 %v1647_v48 }
 0x693   :  { %3325 = vmatprep.mubr.bf16.mxu0 %v1648_v27 }
 0x69a   :  { %3326 = vmatmul.mubr.bf16.gmra.mrb[60].mxu0 %v1649_v32 }
 0x755   :  { %v3315_v49 = vpop.f32.mrb[48].mxu0 }
 0x756   :  { %v1749_v51 = vpop.f32.mrb[49].mxu0 }
 0x757   :  { %v3316_v52 = vpop.f32.mrb[50].mxu0 }
 0x758   :  { %v1813_v10 = vpack.c.bf16 %v3316_v52, %v3315_v49  ;;  %v1752_v55 = vpop.f32.mrb[51].mxu0 }
 0x759   :  { %v1812_v57 = vpack.c.bf16 %v1752_v55, %v1749_v51 }
 0x75b   :  { %3329 = vmatprep.subr.bf16.mxu1 %v1812_v57 }
 0x75c   :  { %3330 = vmatpush3.bf16.msra.mxu1 %v1812_v57 }
 0x75d   :  { %v3319_v63 = vpop.f32.mrb[52].mxu0  ;;  %3331 = vmatprep.subr.bf16.mxu1 %v1813_v10 }
 0x75e   :  { %v1765_v3 = vpop.f32.mrb[53].mxu0 }
 0x75f   :  { %v3320_v47 = vpop.f32.mrb[54].mxu0 }
 0x760   :  { %v1815_v4 = vpack.c.bf16 %v3320_v47, %v3319_v63  ;;  %v1768_v40 = vpop.f32.mrb[55].mxu0  ;;  %3332 = vmatpush3.bf16.msra.mxu1 %v1813_v10 }
 0x761   :  { %v1814_v30 = vpack.c.bf16 %v1768_v40, %v1765_v3 }
 0x763   :  { %3333 = vmatprep.subr.bf16.mxu1 %v1814_v30 }
 0x764   :  { %3334 = vmatpush3.bf16.msra.mxu1 %v1814_v30 }
 0x765   :  { %v3323_v6 = vpop.f32.mrb[56].mxu0  ;;  %3335 = vmatprep.subr.bf16.mxu1 %v1815_v4 }
 0x766   :  { %v1781_v39 = vpop.f32.mrb[57].mxu0 }
 0x767   :  { %v3324_v5 = vpop.f32.mrb[58].mxu0 }
 0x768   :  { %v1817_v8 = vpack.c.bf16 %v3324_v5, %v3323_v6  ;;  %v1784_v11 = vpop.f32.mrb[59].mxu0  ;;  %3336 = vmatpush3.bf16.msra.mxu1 %v1815_v4 }
 0x769   :  { %v1816_v13 = vpack.c.bf16 %v1784_v11, %v1781_v39 }
 0x76b   :  { %3337 = vmatprep.subr.bf16.mxu1 %v1816_v13 }
 0x76c   :  { %3338 = vmatpush3.bf16.msra.mxu1 %v1816_v13 }
 0x76d   :  { %v3327_v60 = vpop.f32.mrb[60].mxu0  ;;  %3339 = vmatprep.subr.bf16.mxu1 %v1817_v8 }
 0x76e   :  { %v1797_v54 = vpop.f32.mrb[61].mxu0 }
 0x76f   :  { %v3328_v59 = vpop.f32.mrb[62].mxu0 }
 0x770   :  { %v1819_v18 = vpack.c.bf16 %v3328_v59, %v3327_v60  ;;  %v1800_v17 = vpop.f32.mrb[63].mxu0  ;;  %3340 = vmatpush3.bf16.msra.mxu1 %v1817_v8 }
 0x771   :  { %v1818_v24 = vpack.c.bf16 %v1800_v17, %v1797_v54 }
 0x773   :  { %3341 = vmatprep.subr.bf16.mxu1 %v1818_v24 }
 0x774   :  { %3342 = vmatpush3.bf16.msra.mxu1 %v1818_v24 }
 0x775   :  { %3343 = vmatprep.subr.bf16.mxu1 %v1819_v18 }
 0x778   :  { %3344 = vmatpush3.bf16.msra.mxu1 %v1819_v18 }
 0x77b   :  { %3346 = vmatmul.mubr.bf16.vlgmr.msra.gmra.mrb[48].mxu1 %v4230_v46  ;;  %v3595_v46 = vld [vmem:[%s5016_s2 + $0x108] sm:$0xff]  }
 0x77c   :  { %3349 = vmatprep.mubr.bf16.mxu1 %v4236_v20  ;;  %3363 = vmatprep.subr.bf16.mxu0 %v3595_v46  ;;  %v3596_v20 = vld [vmem:[%s5016_s2 + $0x110] sm:$0xff]  }
 0x77d   :  { %3364 = vmatpush3.bf16.msra.mxu0 %v3595_v46 }
 0x77e   :  { %3365 = vmatprep.subr.bf16.mxu0 %v3596_v20 }
 0x781   :  { %3366 = vmatpush3.bf16.msra.mxu0 %v3596_v20 }
 0x783   :  { %3350 = vmatmul.mubr.bf16.gmra.mrb[52].mxu1 %v4242_v33  ;;  %v3597_v33 = vld [vmem:[%s5016_s2 + $0x118] sm:$0xff]  }
 0x784   :  { %3353 = vmatprep.mubr.bf16.mxu1 %v4248_v19  ;;  %3367 = vmatprep.subr.bf16.mxu0 %v3597_v33  ;;  %v3598_v19 = vld [vmem:[%s5016_s2 + $0x120] sm:$0xff]  }
 0x785   :  { %3368 = vmatpush3.bf16.msra.mxu0 %v3597_v33 }
 0x786   :  { %3369 = vmatprep.subr.bf16.mxu0 %v3598_v19 }
 0x789   :  { %3370 = vmatpush3.bf16.msra.mxu0 %v3598_v19 }
 0x78b   :  { %3354 = vmatmul.mubr.bf16.gmra.mrb[56].mxu1 %v4254_v26  ;;  %v3599_v26 = vld [vmem:[%s5016_s2 + $0x128] sm:$0xff]  }
 0x78c   :  { %3357 = vmatprep.mubr.bf16.mxu1 %v4260_v25  ;;  %3371 = vmatprep.subr.bf16.mxu0 %v3599_v26  ;;  %v3600_v25 = vld [vmem:[%s5016_s2 + $0x130] sm:$0xff]  }
 0x78d   :  { %3372 = vmatpush3.bf16.msra.mxu0 %v3599_v26 }
 0x78e   :  { %3373 = vmatprep.subr.bf16.mxu0 %v3600_v25 }
 0x791   :  { %3374 = vmatpush3.bf16.msra.mxu0 %v3600_v25 }
 0x793   :  { %3358 = vmatmul.mubr.bf16.gmra.mrb[60].mxu1 %v4266_v35  ;;  %v3601_v35 = vld [vmem:[%s5016_s2 + $0x138] sm:$0xff]  }
 0x794   :  { %3409 = vmatprep.mubr.bf16.mxu1 %v4272_v42  ;;  %3375 = vmatprep.subr.bf16.mxu0 %v3601_v35  ;;  %v4531_v42 = vld [vmem:[%s5019_s3 + $0x3] ss:$0 sm:$0xff] }
 0x795   :  { %3376 = vmatpush3.bf16.msra.mxu0 %v3601_v35 }
 0x84e   :  { %v3347_v58 = vpop.f32.mrb[48].mxu1 }
 0x84f   :  { %v1871_v14 = vadd.f32 %v3347_v58, %v4531_v42  ;;  %v1862_v1 = vpop.f32.mrb[49].mxu1 }
 0x850   :  { %v4535_v28 = vadd.f32 %v4531_v42, %v1862_v1  ;;  %v3348_v38 = vpop.f32.mrb[50].mxu1 }
 0x851   :  { %v1874_v0 = vadd.f32 %v3348_v38, %v4531_v42  ;;  %v1865_v53 = vpop.f32.mrb[51].mxu1  ;;  %v4538_v31 = vmul.f32 0.0, %v1871_v14 }
 0x852   :  { %v4541_v9 = vadd.f32 %v4531_v42, %v1865_v53  ;;  %v1963_v2 = vmul.f32 %v4535_v28, %v4535_v28 }
 0x853   :  { %v4543_v12 = vmul.f32 0.0, %v1874_v0  ;;  %v1965_v44 = vmul.f32 %v4538_v31, %v4538_v31 }
 0x854   :  { %v1941_v16 = vadd.f32 %v4541_v9, %v4535_v28  ;;  %v1964_v43 = vmul.f32 %v4541_v9, %v4541_v9 }
 0x855   :  { %v1966_v29 = vmul.f32 %v4543_v12, %v4543_v12 }
 0x856   :  { %v1942_v45 = vadd.f32 %v1941_v16, %v4538_v31  ;;  %v1979_v23 = vadd.f32 %v1964_v43, %v1963_v2  ;;  %v3351_v15 = vpop.f32.mrb[52].mxu1 }
 0x857   :  { %v1878_v50 = vpop.f32.mrb[53].mxu1  ;;  %v1887_v61 = vadd.f32 %v3351_v15, %v4531_v42 }
 0x858   :  { %v1980_v21 = vadd.f32 %v1979_v23, %v1965_v44  ;;  %v1879_v56 = vadd.f32 %v4531_v42, %v1878_v50  ;;  %v1943_v34 = vadd.f32 %v1942_v45, %v4543_v12  ;;  %v3352_v37 = vpop.f32.mrb[54].mxu1 }
 0x859   :  { %v1890_v41 = vadd.f32 %v3352_v37, %v4531_v42  ;;  %v1881_v62 = vpop.f32.mrb[55].mxu1  ;;  %v4563_v36 = vmul.f32 0.0, %v1887_v61 }
 0x85a   :  { %v4560_v48 = vmul.f32 0.0, %v1879_v56  ;;  %v1981_v27 = vadd.f32 %v1980_v21, %v1966_v29  ;;  %v1882_v7 = vadd.f32 %v4531_v42, %v1881_v62 }
 0x85b   :  { %v4570_v52 = vmul.f32 0.0, %v1890_v41  ;;  %v1969_v4 = vmul.f32 %v4563_v36, %v4563_v36 }
 0x85c   :  { %v1944_v32 = vadd.f32 %v1943_v34, %v4560_v48  ;;  %v1967_v49 = vmul.f32 %v4560_v48, %v4560_v48  ;;  %v4568_v51 = vmul.f32 0.0, %v1882_v7 }
 0x85d   :  { %v1970_v5 = vmul.f32 %v4570_v52, %v4570_v52 }
 0x85e   :  { %v1982_v10 = vadd.f32 %v1981_v27, %v1967_v49  ;;  %v1945_v55 = vadd.f32 %v1944_v32, %v4568_v51  ;;  %v1968_v57 = vmul.f32 %v4568_v51, %v4568_v51  ;;  %v3355_v63 = vpop.f32.mrb[56].mxu1 }
 0x85f   :  { %v1903_v3 = vadd.f32 %v3355_v63, %v4531_v42  ;;  %v1894_v47 = vpop.f32.mrb[57].mxu1 }
 0x860   :  { %v1946_v40 = vadd.f32 %v1945_v55, %v4563_v36  ;;  %v1983_v30 = vadd.f32 %v1982_v10, %v1968_v57  ;;  %v1895_v6 = vadd.f32 %v4531_v42, %v1894_v47  ;;  %v3356_v39 = vpop.f32.mrb[58].mxu1 }
 0x861   :  { %v1906_v8 = vadd.f32 %v3356_v39, %v4531_v42  ;;  %v1897_v11 = vpop.f32.mrb[59].mxu1  ;;  %v4587_v18 = vmul.f32 0.0, %v1903_v3 }
 0x862   :  { %v1984_v13 = vadd.f32 %v1983_v30, %v1969_v4  ;;  %v4583_v60 = vmul.f32 0.0, %v1895_v6  ;;  %v1947_v54 = vadd.f32 %v1946_v40, %v4570_v52  ;;  %v1898_v59 = vadd.f32 %v4531_v42, %v1897_v11 }
 0x863   :  { %v4594_v20 = vmul.f32 0.0, %v1906_v8  ;;  %v1973_v14 = vmul.f32 %v4587_v18, %v4587_v18 }
 0x864   :  { %v1948_v17 = vadd.f32 %v1947_v54, %v4583_v60  ;;  %v1971_v24 = vmul.f32 %v4583_v60, %v4583_v60  ;;  %v1985_v22 = vadd.f32 %v1984_v13, %v1970_v5  ;;  %v4592_v46 = vmul.f32 0.0, %v1898_v59 }
 0x865   :  { %v1974_v2 = vmul.f32 %v4594_v20, %v4594_v20 }
 0x866   :  { %v1986_v33 = vadd.f32 %v1985_v22, %v1971_v24  ;;  %v1949_v19 = vadd.f32 %v1948_v17, %v4592_v46  ;;  %v1972_v26 = vmul.f32 %v4592_v46, %v4592_v46  ;;  %v3359_v25 = vpop.f32.mrb[60].mxu1 }
 0x867   :  { %v1919_v35 = vadd.f32 %v3359_v25, %v4531_v42  ;;  %v1910_v58 = vpop.f32.mrb[61].mxu1 }
 0x868   :  { %v1950_v1 = vadd.f32 %v1949_v19, %v4587_v18  ;;  %v1987_v38 = vadd.f32 %v1986_v33, %v1972_v26  ;;  %v1911_v0 = vadd.f32 %v4531_v42, %v1910_v58  ;;  %v3360_v53 = vpop.f32.mrb[62].mxu1 }
 0x869   :  { %v1922_v16 = vadd.f32 %v3360_v53, %v4531_v42  ;;  %v1913_v43 = vpop.f32.mrb[63].mxu1  ;;  %v4611_v29 = vmul.f32 0.0, %v1919_v35  ;;  %v4673_v53 = vld [vmem:[%s5021_s5 + $0x3] ss:$0 sm:$0xff] }
 0x86a   :  { %v1988_v44 = vadd.f32 %v1987_v38, %v1973_v14  ;;  %v4607_v45 = vmul.f32 0.0, %v1911_v0  ;;  %v1951_v23 = vadd.f32 %v1950_v1, %v4594_v20  ;;  %v1914_v15 = vadd.f32 %v4531_v42, %v1913_v43 }
 0x86b   :  { %v4616_v37 = vmul.f32 0.0, %v1922_v16  ;;  %v1977_v27 = vmul.f32 %v4611_v29, %v4611_v29 }
 0x86c   :  { %v1952_v50 = vadd.f32 %v1951_v23, %v4607_v45  ;;  %v1975_v21 = vmul.f32 %v4607_v45, %v4607_v45  ;;  %v1989_v61 = vadd.f32 %v1988_v44, %v1974_v2  ;;  %v1938_v56 = vmul.f32 0.0, %v1914_v15 }
 0x86d   :  { %v1978_v32 = vmul.f32 %v4616_v37, %v4616_v37 }
 0x86e   :  { %v1990_v34 = vadd.f32 %v1989_v61, %v1975_v21  ;;  %v1953_v41 = vadd.f32 %v1952_v50, %v1938_v56  ;;  %v1976_v62 = vmul.f32 %v1938_v56, %v1938_v56 }
 0x870   :  { %v1954_v7 = vadd.f32 %v1953_v41, %v4611_v29  ;;  %v1991_v42 = vadd.f32 %v1990_v34, %v1976_v62 }
 0x872   :  { %v1955_v49 = vadd.f32 %v1954_v7, %v4616_v37  ;;  %v1992_v10 = vadd.f32 %v1991_v42, %v1977_v27 }
 0x874   :  { %v1956_v55 = vrot.slane %v1955_v49, 4  ;;  %v1993_v57 = vadd.f32 %v1992_v10, %v1978_v32 }
 0x876   :  { %v1957_v63 = vadd.f32 %v1956_v55, %v1955_v49  ;;  %v1994_v3 = vrot.slane %v1993_v57, 4 }
 0x878   :  { %v1958_v47 = vrot.slane %v1957_v63, 2  ;;  %v1995_v4 = vadd.f32 %v1994_v3, %v1993_v57 }
 0x87a   :  { %v1959_v40 = vadd.f32 %v1958_v47, %v1957_v63  ;;  %v1996_v30 = vrot.slane %v1995_v4, 2 }
 0x87c   :  { %v1960_v6 = vrot.slane %v1959_v40, 1  ;;  %v1997_v39 = vadd.f32 %v1996_v30, %v1995_v4 }
 0x87e   :  { %v1961_v5 = vadd.f32 %v1960_v6, %v1959_v40  ;;  %v1998_v8 = vrot.slane %v1997_v39, 1 }
 0x880   :  { %v4624_v11 = vmul.f32 0.0625, %v1961_v5  ;;  %v1999_v13 = vadd.f32 %v1998_v8, %v1997_v39 }
 0x882   :  { %v2000_v54 = vmul.f32 0.0625, %v1999_v13  ;;  %v2001_v59 = vmul.f32 %v4624_v11, %v4624_v11  ;;  %v2017_v17 = vsub.f32 %v1938_v56, %v4624_v11  ;;  %v2004_v24 = vsub.f32 %v4535_v28, %v4624_v11 }
 0x883   :  { %v2005_v22 = vsub.f32 %v4541_v9, %v4624_v11  ;;  %v2006_v33 = vsub.f32 %v4538_v31, %v4624_v11  ;;  %v2007_v19 = vsub.f32 %v4543_v12, %v4624_v11  ;;  %v2008_v26 = vsub.f32 %v4560_v48, %v4624_v11 }
 0x884   :  { %v2002_v25 = vsub.f32 %v2000_v54, %v2001_v59  ;;  %v2009_v35 = vsub.f32 %v4568_v51, %v4624_v11  ;;  %v2010_v58 = vsub.f32 %v4563_v36, %v4624_v11  ;;  %v2011_v28 = vsub.f32 %v4570_v52, %v4624_v11 }
 0x885   :  { %v2012_v9 = vsub.f32 %v4583_v60, %v4624_v11  ;;  %v2013_v31 = vsub.f32 %v4592_v46, %v4624_v11  ;;  %v2014_v12 = vsub.f32 %v4587_v18, %v4624_v11  ;;  %v2015_v48 = vsub.f32 %v4594_v20, %v4624_v11  ;;  %v4664_v18 = vld [vmem:[%s5020_s4 + $0x3] ss:$0 sm:$0xff] }
 0x886   :  { %v2003_v14 = vmax.f32 %v2002_v25, 0.0  ;;  %v2016_v51 = vsub.f32 %v4607_v45, %v4624_v11  ;;  %v2018_v36 = vsub.f32 %v4611_v29, %v4624_v11  ;;  %v2019_v52 = vsub.f32 %v4616_v37, %v4624_v11 }
 0x888   :  { %v2020_v60 = vadd.f32 1e-05, %v2003_v14 }
 0x88a   :  { %3608 = vrsqrt.f32 %v2020_v60 }
 0x894   :  { %v4659_v1 = vpop.eup %3608 }
 0x895   :  { %v2035_v46 = vmul.f32 %v4659_v1, %v2017_v17  ;;  %v2022_v20 = vmul.f32 %v4659_v1, %v2004_v24  ;;  %v2023_v38 = vmul.f32 %v4659_v1, %v2005_v22  ;;  %v2024_v0 = vmul.f32 %v4659_v1, %v2006_v33 }
 0x896   :  { %v2025_v2 = vmul.f32 %v4659_v1, %v2007_v19  ;;  %v2026_v16 = vmul.f32 %v4659_v1, %v2008_v26  ;;  %v2027_v43 = vmul.f32 %v4659_v1, %v2009_v35  ;;  %v2028_v44 = vmul.f32 %v4659_v1, %v2010_v58 }
 0x897   :  { %v2046_v45 = vmul.f32 %v4664_v18, %v2022_v20  ;;  %v2047_v23 = vmul.f32 %v4664_v18, %v2023_v38  ;;  %v2048_v15 = vmul.f32 %v4664_v18, %v2024_v0  ;;  %v2029_v50 = vmul.f32 %v4659_v1, %v2011_v28 }
 0x898   :  { %v2049_v21 = vmul.f32 %v4664_v18, %v2025_v2  ;;  %v2050_v61 = vmul.f32 %v4664_v18, %v2026_v16  ;;  %v2051_v56 = vmul.f32 %v4664_v18, %v2027_v43  ;;  %v2052_v34 = vmul.f32 %v4664_v18, %v2028_v44 }
 0x899   :  { %v2070_v41 = vadd.f32 %v4673_v53, %v2046_v45  ;;  %v2071_v62 = vadd.f32 %v4673_v53, %v2047_v23  ;;  %v2072_v27 = vadd.f32 %v4673_v53, %v2048_v15  ;;  %v2053_v7 = vmul.f32 %v4664_v18, %v2029_v50 }
 0x89a   :  { %v2073_v42 = vadd.f32 %v4673_v53, %v2049_v21  ;;  %v2074_v32 = vadd.f32 %v4673_v53, %v2050_v61  ;;  %v2075_v49 = vadd.f32 %v4673_v53, %v2051_v56  ;;  %v2076_v10 = vadd.f32 %v4673_v53, %v2052_v34 }
 0x89b   :  { %v2086_v55 = vmax.f32 %v2070_v41, 0.0  ;;  %v2087_v57 = vmax.f32 %v2071_v62, 0.0  ;;  %v2088_v63 = vmax.f32 %v2072_v27, 0.0  ;;  %v2077_v3 = vadd.f32 %v4673_v53, %v2053_v7 }
 0x89c   :  { %v2089_v47 = vmax.f32 %v2073_v42, 0.0  ;;  %v2090_v4 = vmax.f32 %v2074_v32, 0.0  ;;  %v2091_v40 = vmax.f32 %v2075_v49, 0.0  ;;  %v2092_v30 = vmax.f32 %v2076_v10, 0.0 }
 0x89d   :  { %v2118_v6 = vpack.c.bf16 %v2087_v57, %v2086_v55  ;;  %v2104_v39 = vmul.f32 0.0, %v2088_v63  ;;  %v2093_v5 = vmax.f32 %v2077_v3, 0.0  ;;  %v2030_v8 = vmul.f32 %v4659_v1, %v2012_v9 }
 0x89e   :  { %v2105_v13 = vmul.f32 0.0, %v2089_v47  ;;  %v2106_v54 = vmul.f32 0.0, %v2090_v4  ;;  %v2107_v59 = vmul.f32 0.0, %v2091_v40  ;;  %v2108_v17 = vmul.f32 0.0, %v2092_v30 }
 0x89f   :  { %3377 = vmatprep.mubr.bf16.mxu0 %v2118_v6  ;;  %v2109_v24 = vmul.f32 0.0, %v2093_v5  ;;  %v2031_v22 = vmul.f32 %v4659_v1, %v2013_v31  ;;  %v2054_v33 = vmul.f32 %v4664_v18, %v2030_v8  ;;  %v2032_v19 = vmul.f32 %v4659_v1, %v2014_v12 }
 0x8a0   :  { %v2119_v26 = vpack.c.bf16 %v2105_v13, %v2104_v39  ;;  %v2120_v25 = vpack.c.bf16 %v2107_v59, %v2106_v54  ;;  %v2033_v35 = vmul.f32 %v4659_v1, %v2015_v48  ;;  %v2034_v58 = vmul.f32 %v4659_v1, %v2016_v51 }
 0x8a1   :  { %v2121_v28 = vpack.c.bf16 %v2109_v24, %v2108_v17  ;;  %v2055_v9 = vmul.f32 %v4664_v18, %v2031_v22  ;;  %v2078_v14 = vadd.f32 %v4673_v53, %v2054_v33  ;;  %v2056_v60 = vmul.f32 %v4664_v18, %v2032_v19 }
 0x8a2   :  { %3378 = vmatmul.mubr.bf16.vlgmr.msra.gmra.mrb[64].mxu0 %v2119_v26  ;;  %v2057_v31 = vmul.f32 %v4664_v18, %v2033_v35  ;;  %v2058_v20 = vmul.f32 %v4664_v18, %v2034_v58  ;;  %v2059_v12 = vmul.f32 %v4664_v18, %v2035_v46  ;;  %v2036_v48 = vmul.f32 %v4659_v1, %v2018_v36  ;;  %v3620_v35 = vld [vmem:[%s5018_s0 + $0x8] sm:$0xff]   ;;  %v3621_v58 = vld [vmem:[%s5018_s0 + $0x10] sm:$0xff]  }
 0x8a3   :  { %3381 = vmatprep.mubr.bf16.mxu0 %v2120_v25  ;;  %v2079_v51 = vadd.f32 %v4673_v53, %v2055_v9  ;;  %v2094_v38 = vmax.f32 %v2078_v14, 0.0  ;;  %v2080_v0 = vadd.f32 %v4673_v53, %v2056_v60  ;;  %v2037_v2 = vmul.f32 %v4659_v1, %v2019_v52  ;;  %v3623_v9 = vld [vmem:[%s5018_s0 + $0x20] sm:$0xff]   ;;  %v3624_v14 = vld [vmem:[%s5018_s0 + $0x28] sm:$0xff]   ;;  %v3625_v60 = vld [vmem:[%s5018_s0 + $0x30] sm:$0xff]  }
 0x8a4   :  { %v2081_v16 = vadd.f32 %v4673_v53, %v2057_v31  ;;  %v2082_v46 = vadd.f32 %v4673_v53, %v2058_v20  ;;  %v2083_v43 = vadd.f32 %v4673_v53, %v2059_v12  ;;  %v2060_v29 = vmul.f32 %v4664_v18, %v2036_v48  ;;  %v3626_v31 = vld [vmem:[%s5018_s0 + $0x38] sm:$0xff]   ;;  %v2665_v48 = vld [vmem:[%s5022_s7] sm:$0xff] }
 0x8a5   :  { %v2095_v36 = vmax.f32 %v2079_v51, 0.0  ;;  %v2110_v44 = vmul.f32 0.0, %v2094_v38  ;;  %v2096_v45 = vmax.f32 %v2080_v0, 0.0  ;;  %v2061_v23 = vmul.f32 %v4664_v18, %v2037_v2  ;;  %v2666_v51 = vld [vmem:[%s5022_s7 + $0x8] sm:$0xff]  ;;  %v2667_v38 = vld [vmem:[%s5022_s7 + $0x10] sm:$0xff]  ;;  %v2668_v2 = vld [vmem:[%s5022_s7 + $0x18] sm:$0xff] }
 0x8a6   :  { %v2097_v15 = vmax.f32 %v2081_v16, 0.0  ;;  %v2098_v50 = vmax.f32 %v2082_v46, 0.0  ;;  %v2099_v21 = vmax.f32 %v2083_v43, 0.0  ;;  %v2084_v37 = vadd.f32 %v4673_v53, %v2060_v29  ;;  %v2669_v46 = vld [vmem:[%s5022_s7 + $0x20] sm:$0xff]  ;;  %v2670_v43 = vld [vmem:[%s5022_s7 + $0x28] sm:$0xff] }
 0x8a7   :  { %v2111_v11 = vmul.f32 0.0, %v2095_v36  ;;  %v2112_v52 = vmul.f32 0.0, %v2096_v45  ;;  %v2085_v1 = vadd.f32 %v4673_v53, %v2061_v23  ;;  %v3627_v20 = vmov 0.0|0.0   ;;  %v2671_v36 = vld [vmem:[%s5022_s7 + $0x30] sm:$0xff]  ;;  %v2673_v23 = vld [vmem:[%s5022_s7 + $0x40] sm:$0xff] }
 0x8a8   :  { %v2113_v61 = vmul.f32 0.0, %v2097_v15  ;;  %v2114_v56 = vmul.f32 0.0, %v2098_v50  ;;  %v2115_v34 = vmul.f32 0.0, %v2099_v21  ;;  %v2100_v41 = vmax.f32 %v2084_v37, 0.0  ;;  %3495 = vmatprep.subr.bf16.mxu0 %v3627_v20  ;;  %v2674_v15 = vld [vmem:[%s5022_s7 + $0x48] sm:$0xff] }
 0x8a9   :  { %v2122_v62 = vpack.c.bf16 %v2111_v11, %v2110_v44  ;;  %v2101_v27 = vmax.f32 %v2085_v1, 0.0  ;;  %v3629_v12 = vmov 0.0   ;;  %v3520_v0 = vpack.c.bf16 %v2666_v51, %v2665_v48  ;;  %v2672_v44 = vld [vmem:[%s5022_s7 + $0x38] sm:$0xff]  ;;  %v4784_v50 = vld [vmem:[%s5019_s3 + $0x4] ss:$0 sm:$0xff]  ;;  %v2675_v1 = vld [vmem:[%s5022_s7 + $0x50] sm:$0xff] }
 0x8aa   :  { %3382 = vmatmul.mubr.bf16.gmra.mrb[68].mxu0 %v2121_v28  ;;  %v2123_v7 = vpack.c.bf16 %v2113_v61, %v2112_v52  ;;  %v2124_v42 = vpack.c.bf16 %v2115_v34, %v2114_v56  ;;  %v2116_v32 = vmul.f32 0.0, %v2100_v41  ;;  %v3622_v28 = vld [vmem:[%s5018_s0 + $0x18] sm:$0xff]   ;;  %v3523_v16 = vpack.c.bf16 %v2668_v2, %v2667_v38 }
 0x8ab   :  { %3385 = vmatprep.mubr.bf16.mxu0 %v2122_v62  ;;  %v2117_v18 = vmul.f32 0.0, %v2101_v27  ;;  %v3526_v29 = vpack.c.bf16 %v2670_v43, %v2669_v46  ;;  %v3529_v45 = vpack.c.bf16 %v2672_v44, %v2671_v36  ;;  %v3532_v37 = vpack.c.bf16 %v2674_v15, %v2673_v23  ;;  %v2676_v61 = vld [vmem:[%s5022_s7 + $0x58] sm:$0xff] }
 0x8ad   :  { %v2125_v49 = vpack.c.bf16 %v2117_v18, %v2116_v32  ;;  %v2677_v18 = vld [vmem:[%s5022_s7 + $0x60] sm:$0xff] }
 0x8b2   :  { %3386 = vmatmul.mubr.bf16.gmra.mrb[72].mxu0 %v2123_v7 }
 0x8b3   :  { %3389 = vmatprep.mubr.bf16.mxu0 %v2124_v42  ;;  %v3535_v42 = vpack.c.bf16 %v2676_v61, %v2675_v1 }
 0x8ba   :  { %3390 = vmatmul.mubr.bf16.gmra.mrb[76].mxu0 %v2125_v49  ;;  %v2678_v49 = vld [vmem:[%s5022_s7 + $0x68] sm:$0xff] }
 0x8bb   :  { %3457 = vmatprep.mubr.msk.f32.mxu0 %vm3628_vm0, %v3629_v12 }
 0x975   :  { %v3379_v10 = vpop.f32.mrb[64].mxu0 }
 0x976   :  { %v2225_v55 = vpop.f32.mrb[65].mxu0 }
 0x977   :  { %v3380_v57 = vpop.f32.mrb[66].mxu0 }
 0x978   :  { %v2289_v53 = vpack.c.bf16 %v3380_v57, %v3379_v10  ;;  %v2228_v63 = vpop.f32.mrb[67].mxu0 }
 0x979   :  { %v2288_v3 = vpack.c.bf16 %v2228_v63, %v2225_v55 }
 0x97b   :  { %3393 = vmatprep.subr.bf16.mxu1 %v2288_v3 }
 0x97c   :  { %3394 = vmatpush3.bf16.msra.mxu1 %v2288_v3 }
 0x97d   :  { %v3383_v47 = vpop.f32.mrb[68].mxu0  ;;  %3395 = vmatprep.subr.bf16.mxu1 %v2289_v53 }
 0x97e   :  { %v2241_v4 = vpop.f32.mrb[69].mxu0 }
 0x97f   :  { %v3384_v40 = vpop.f32.mrb[70].mxu0 }
 0x980   :  { %v2291_v30 = vpack.c.bf16 %v3384_v40, %v3383_v47  ;;  %v2244_v6 = vpop.f32.mrb[71].mxu0  ;;  %3396 = vmatpush3.bf16.msra.mxu1 %v2289_v53 }
 0x981   :  { %v2290_v39 = vpack.c.bf16 %v2244_v6, %v2241_v4  ;;  %v3538_v4 = vpack.c.bf16 %v2678_v49, %v2677_v18  ;;  %v2679_v6 = vld [vmem:[%s5022_s7 + $0x70] sm:$0xff] }
 0x983   :  { %3397 = vmatprep.subr.bf16.mxu1 %v2290_v39 }
 0x984   :  { %3398 = vmatpush3.bf16.msra.mxu1 %v2290_v39  ;;  %v2680_v39 = vld [vmem:[%s5022_s7 + $0x78] sm:$0xff] }
 0x985   :  { %v3387_v5 = vpop.f32.mrb[72].mxu0  ;;  %3399 = vmatprep.subr.bf16.mxu1 %v2291_v30 }
 0x986   :  { %v2257_v8 = vpop.f32.mrb[73].mxu0 }
 0x987   :  { %v3388_v13 = vpop.f32.mrb[74].mxu0 }
 0x988   :  { %v2293_v54 = vpack.c.bf16 %v3388_v13, %v3387_v5  ;;  %v2260_v59 = vpop.f32.mrb[75].mxu0  ;;  %3400 = vmatpush3.bf16.msra.mxu1 %v2291_v30 }
 0x989   :  { %v2292_v17 = vpack.c.bf16 %v2260_v59, %v2257_v8 }
 0x98b   :  { %3401 = vmatprep.subr.bf16.mxu1 %v2292_v17 }
 0x98c   :  { %3402 = vmatpush3.bf16.msra.mxu1 %v2292_v17 }
 0x98d   :  { %v3391_v24 = vpop.f32.mrb[76].mxu0  ;;  %3403 = vmatprep.subr.bf16.mxu1 %v2293_v54 }
 0x98e   :  { %v2273_v22 = vpop.f32.mrb[77].mxu0 }
 0x98f   :  { %v3392_v33 = vpop.f32.mrb[78].mxu0 }
 0x990   :  { %v2295_v19 = vpack.c.bf16 %v3392_v33, %v3391_v24  ;;  %v2276_v26 = vpop.f32.mrb[79].mxu0  ;;  %3404 = vmatpush3.bf16.msra.mxu1 %v2293_v54 }
 0x991   :  { %v2294_v25 = vpack.c.bf16 %v2276_v26, %v2273_v22  ;;  %v3541_v26 = vpack.c.bf16 %v2680_v39, %v2679_v6 }
 0x993   :  { %3405 = vmatprep.subr.bf16.mxu1 %v2294_v25 }
 0x994   :  { %3406 = vmatpush3.bf16.msra.mxu1 %v2294_v25 }
 0x995   :  { %3407 = vmatprep.subr.bf16.mxu1 %v2295_v19 }
 0x998   :  { %3408 = vmatpush3.bf16.msra.mxu1 %v2295_v19 }
 0x999   :  { %3519 = vmatprep.subr.bf16.mxu1 %v3627_v20 }
 0x99b   :  { %3410 = vmatmul.mubr.bf16.vlgmr.msra.gmra.mrb[64].mxu1 %v3620_v35 }
 0x99c   :  { %3413 = vmatprep.mubr.bf16.mxu1 %v3621_v58  ;;  %3521 = vmatpush3.bf16.msra.mxu1 %v3520_v0 }
 0x99d   :  { %3522 = vmatprep.subr.bf16.mxu1 %v3627_v20 }
 0x9a0   :  { %3524 = vmatpush3.bf16.msra.mxu1 %v3523_v16 }
 0x9a1   :  { %3525 = vmatprep.subr.bf16.mxu1 %v3627_v20 }
 0x9a3   :  { %3414 = vmatmul.mubr.bf16.gmra.mrb[68].mxu1 %v3622_v28 }
 0x9a4   :  { %3417 = vmatprep.mubr.bf16.mxu1 %v3623_v9  ;;  %3527 = vmatpush3.bf16.msra.mxu1 %v3526_v29 }
 0x9a5   :  { %3528 = vmatprep.subr.bf16.mxu1 %v3627_v20 }
 0x9a8   :  { %3530 = vmatpush3.bf16.msra.mxu1 %v3529_v45 }
 0x9a9   :  { %3531 = vmatprep.subr.bf16.mxu1 %v3627_v20 }
 0x9ab   :  { %3418 = vmatmul.mubr.bf16.gmra.mrb[72].mxu1 %v3624_v14 }
 0x9ac   :  { %3421 = vmatprep.mubr.bf16.mxu1 %v3625_v60  ;;  %3533 = vmatpush3.bf16.msra.mxu1 %v3532_v37 }
 0x9ad   :  { %3534 = vmatprep.subr.bf16.mxu1 %v3627_v20 }
 0x9b0   :  { %3536 = vmatpush3.bf16.msra.mxu1 %v3535_v42 }
 0x9b1   :  { %3537 = vmatprep.subr.bf16.mxu1 %v3627_v20 }
 0x9b3   :  { %3422 = vmatmul.mubr.bf16.gmra.mrb[76].mxu1 %v3626_v31 }
 0x9b4   :  { %3492 = vmatprep.mubr.msk.f32.mxu1 %vm3628_vm0, %v3629_v12  ;;  %3539 = vmatpush3.bf16.msra.mxu1 %v3538_v4 }
 0x9b5   :  { %3540 = vmatprep.subr.bf16.mxu1 %v3627_v20 }
 0x9b8   :  { %3542 = vmatpush3.bf16.msra.mxu1 %v3541_v26 }
 0xa6e   :  { %v3411_v21 = vpop.f32.mrb[64].mxu1 }
 0xa6f   :  { %v2347_v11 = vadd.f32 %v3411_v21, %v4784_v50  ;;  %v2338_v52 = vpop.f32.mrb[65].mxu1 }
 0xa70   :  { %v4795_v56 = vadd.f32 %v4784_v50, %v2338_v52  ;;  %v3412_v34 = vpop.f32.mrb[66].mxu1 }
 0xa71   :  { %v2350_v41 = vadd.f32 %v3412_v34, %v4784_v50  ;;  %v2341_v62 = vpop.f32.mrb[67].mxu1  ;;  %v4798_v27 = vmul.f32 0.0, %v2347_v11 }
 0xa72   :  { %v4801_v7 = vadd.f32 %v4784_v50, %v2341_v62  ;;  %v2439_v10 = vmul.f32 %v4795_v56, %v4795_v56 }
 0xa73   :  { %v4803_v32 = vmul.f32 0.0, %v2350_v41  ;;  %v2441_v53 = vmul.f32 %v4798_v27, %v4798_v27 }
 0xa74   :  { %v2417_v55 = vadd.f32 %v4801_v7, %v4795_v56  ;;  %v2440_v57 = vmul.f32 %v4801_v7, %v4801_v7 }
 0xa75   :  { %v2442_v40 = vmul.f32 %v4803_v32, %v4803_v32 }
 0xa76   :  { %v2418_v63 = vadd.f32 %v2417_v55, %v4798_v27  ;;  %v2455_v3 = vadd.f32 %v2440_v57, %v2439_v10  ;;  %v3415_v47 = vpop.f32.mrb[68].mxu1 }
 0xa77   :  { %v2354_v30 = vpop.f32.mrb[69].mxu1  ;;  %v2363_v8 = vadd.f32 %v3415_v47, %v4784_v50 }
 0xa78   :  { %v2456_v5 = vadd.f32 %v2455_v3, %v2441_v53  ;;  %v2355_v13 = vadd.f32 %v4784_v50, %v2354_v30  ;;  %v2419_v54 = vadd.f32 %v2418_v63, %v4803_v32  ;;  %v3416_v59 = vpop.f32.mrb[70].mxu1 }
 0xa79   :  { %v2366_v17 = vadd.f32 %v3416_v59, %v4784_v50  ;;  %v2357_v24 = vpop.f32.mrb[71].mxu1  ;;  %v4838_v25 = vmul.f32 0.0, %v2363_v8 }
 0xa7a   :  { %v4834_v22 = vmul.f32 0.0, %v2355_v13  ;;  %v2457_v33 = vadd.f32 %v2456_v5, %v2442_v40  ;;  %v2358_v19 = vadd.f32 %v4784_v50, %v2357_v24 }
 0xa7b   :  { %v4845_v9 = vmul.f32 0.0, %v2366_v17  ;;  %v2445_v38 = vmul.f32 %v4838_v25, %v4838_v25 }
 0xa7c   :  { %v2420_v35 = vadd.f32 %v2419_v54, %v4834_v22  ;;  %v2443_v58 = vmul.f32 %v4834_v22, %v4834_v22  ;;  %v4843_v28 = vmul.f32 0.0, %v2358_v19 }
 0xa7d   :  { %v2446_v43 = vmul.f32 %v4845_v9, %v4845_v9 }
 0xa7e   :  { %v2458_v14 = vadd.f32 %v2457_v33, %v2443_v58  ;;  %v2421_v60 = vadd.f32 %v2420_v35, %v4843_v28  ;;  %v2444_v31 = vmul.f32 %v4843_v28, %v4843_v28  ;;  %v3419_v12 = vpop.f32.mrb[72].mxu1 }
 0xa7f   :  { %v2379_v48 = vadd.f32 %v3419_v12, %v4784_v50  ;;  %v2370_v51 = vpop.f32.mrb[73].mxu1 }
 0xa80   :  { %v2422_v0 = vadd.f32 %v2421_v60, %v4838_v25  ;;  %v2459_v2 = vadd.f32 %v2458_v14, %v2444_v31  ;;  %v2371_v16 = vadd.f32 %v4784_v50, %v2370_v51  ;;  %v3420_v46 = vpop.f32.mrb[74].mxu1 }
 0xa81   :  { %v2382_v29 = vadd.f32 %v3420_v46, %v4784_v50  ;;  %v2373_v36 = vpop.f32.mrb[75].mxu1  ;;  %v4862_v21 = vmul.f32 0.0, %v2379_v48 }
 0xa82   :  { %v2460_v44 = vadd.f32 %v2459_v2, %v2445_v38  ;;  %v4858_v45 = vmul.f32 0.0, %v2371_v16  ;;  %v2423_v23 = vadd.f32 %v2422_v0, %v4845_v9  ;;  %v2374_v15 = vadd.f32 %v4784_v50, %v2373_v36 }
 0xa83   :  { %v4869_v61 = vmul.f32 0.0, %v2382_v29  ;;  %v2449_v10 = vmul.f32 %v4862_v21, %v4862_v21 }
 0xa84   :  { %v2424_v37 = vadd.f32 %v2423_v23, %v4858_v45  ;;  %v2447_v11 = vmul.f32 %v4858_v45, %v4858_v45  ;;  %v2461_v52 = vadd.f32 %v2460_v44, %v2446_v43  ;;  %v4867_v1 = vmul.f32 0.0, %v2374_v15 }
 0xa85   :  { %v2450_v3 = vmul.f32 %v4869_v61, %v4869_v61 }
 0xa86   :  { %v2462_v34 = vadd.f32 %v2461_v52, %v2447_v11  ;;  %v2425_v41 = vadd.f32 %v2424_v37, %v4867_v1  ;;  %v2448_v62 = vmul.f32 %v4867_v1, %v4867_v1  ;;  %v3423_v42 = vpop.f32.mrb[76].mxu1 }
 0xa87   :  { %v2395_v18 = vadd.f32 %v3423_v42, %v4784_v50  ;;  %v2386_v49 = vpop.f32.mrb[77].mxu1 }
 0xa88   :  { %v2426_v55 = vadd.f32 %v2425_v41, %v4862_v21  ;;  %v2463_v57 = vadd.f32 %v2462_v34, %v2448_v62  ;;  %v2387_v53 = vadd.f32 %v4784_v50, %v2386_v49  ;;  %v3424_v63 = vpop.f32.mrb[78].mxu1 }
 0xa89   :  { %v2398_v47 = vadd.f32 %v3424_v63, %v4784_v50  ;;  %v2389_v4 = vpop.f32.mrb[79].mxu1  ;;  %v4886_v5 = vmul.f32 0.0, %v2395_v18 }
 0xa8a   :  { %v2464_v40 = vadd.f32 %v2463_v57, %v2449_v10  ;;  %v4882_v30 = vmul.f32 0.0, %v2387_v53  ;;  %v2427_v6 = vadd.f32 %v2426_v55, %v4869_v61  ;;  %v2390_v39 = vadd.f32 %v4784_v50, %v2389_v4 }
 0xa8b   :  { %v4891_v24 = vmul.f32 0.0, %v2398_v47  ;;  %v2453_v26 = vmul.f32 %v4886_v5, %v4886_v5 }
 0xa8c   :  { %v2428_v8 = vadd.f32 %v2427_v6, %v4882_v30  ;;  %v2451_v13 = vmul.f32 %v4882_v30, %v4882_v30  ;;  %v2465_v54 = vadd.f32 %v2464_v40, %v2450_v3  ;;  %v2414_v59 = vmul.f32 0.0, %v2390_v39  ;;  %v4948_v3 = vld [vmem:[%s5021_s5 + $0x4] ss:$0 sm:$0xff] }
 0xa8d   :  { %v2454_v58 = vmul.f32 %v4891_v24, %v4891_v24 }
 0xa8e   :  { %v2466_v17 = vadd.f32 %v2465_v54, %v2451_v13  ;;  %v2429_v33 = vadd.f32 %v2428_v8, %v2414_v59  ;;  %v2452_v19 = vmul.f32 %v2414_v59, %v2414_v59 }
 0xa90   :  { %v2430_v35 = vadd.f32 %v2429_v33, %v4886_v5  ;;  %v2467_v50 = vadd.f32 %v2466_v17, %v2452_v19 }
 0xa92   :  { %v2431_v14 = vadd.f32 %v2430_v35, %v4891_v24  ;;  %v2468_v60 = vadd.f32 %v2467_v50, %v2453_v26 }
 0xa94   :  { %v2432_v31 = vrot.slane %v2431_v14, 4  ;;  %v2469_v12 = vadd.f32 %v2468_v60, %v2454_v58 }
 0xa96   :  { %v2433_v48 = vadd.f32 %v2432_v31, %v2431_v14  ;;  %v2470_v51 = vrot.slane %v2469_v12, 4 }
 0xa98   :  { %v2434_v38 = vrot.slane %v2433_v48, 2  ;;  %v2471_v0 = vadd.f32 %v2470_v51, %v2469_v12 }
 0xa9a   :  { %v2435_v2 = vadd.f32 %v2434_v38, %v2433_v48  ;;  %v2472_v16 = vrot.slane %v2471_v0, 2 }
 0xa9c   :  { %v2436_v46 = vrot.slane %v2435_v2, 1  ;;  %v2473_v43 = vadd.f32 %v2472_v16, %v2471_v0 }
 0xa9e   :  { %v2437_v29 = vadd.f32 %v2436_v46, %v2435_v2  ;;  %v2474_v36 = vrot.slane %v2473_v43, 1 }
 0xaa0   :  { %v4899_v44 = vmul.f32 0.0625, %v2437_v29  ;;  %v2475_v23 = vadd.f32 %v2474_v36, %v2473_v43 }
 0xaa2   :  { %v2476_v15 = vmul.f32 0.0625, %v2475_v23  ;;  %v2477_v37 = vmul.f32 %v4899_v44, %v4899_v44  ;;  %v2493_v11 = vsub.f32 %v2414_v59, %v4899_v44  ;;  %v2480_v52 = vsub.f32 %v4795_v56, %v4899_v44 }
 0xaa3   :  { %v2481_v34 = vsub.f32 %v4801_v7, %v4899_v44  ;;  %v2482_v41 = vsub.f32 %v4798_v27, %v4899_v44  ;;  %v2483_v62 = vsub.f32 %v4803_v32, %v4899_v44  ;;  %v2484_v42 = vsub.f32 %v4834_v22, %v4899_v44 }
 0xaa4   :  { %v2478_v18 = vsub.f32 %v2476_v15, %v2477_v37  ;;  %v2485_v49 = vsub.f32 %v4843_v28, %v4899_v44  ;;  %v2486_v10 = vsub.f32 %v4838_v25, %v4899_v44  ;;  %v2487_v56 = vsub.f32 %v4845_v9, %v4899_v44 }
 0xaa5   :  { %v2488_v7 = vsub.f32 %v4858_v45, %v4899_v44  ;;  %v2489_v27 = vsub.f32 %v4867_v1, %v4899_v44  ;;  %v2490_v32 = vsub.f32 %v4862_v21, %v4899_v44  ;;  %v2491_v22 = vsub.f32 %v4869_v61, %v4899_v44  ;;  %v4939_v21 = vld [vmem:[%s5020_s4 + $0x4] ss:$0 sm:$0xff] }
 0xaa6   :  { %v2479_v55 = vmax.f32 %v2478_v18, 0.0  ;;  %v2492_v28 = vsub.f32 %v4882_v30, %v4899_v44  ;;  %v2494_v25 = vsub.f32 %v4886_v5, %v4899_v44  ;;  %v2495_v9 = vsub.f32 %v4891_v24, %v4899_v44 }
 0xaa8   :  { %v2496_v45 = vadd.f32 1e-05, %v2479_v55 }
 0xaaa   :  { %3610 = vrsqrt.f32 %v2496_v45 }
 0xab4   :  { %v4934_v57 = vpop.eup %3610 }
 0xab5   :  { %v2511_v1 = vmul.f32 %v4934_v57, %v2493_v11  ;;  %v2498_v61 = vmul.f32 %v4934_v57, %v2480_v52  ;;  %v2499_v53 = vmul.f32 %v4934_v57, %v2481_v34  ;;  %v2500_v63 = vmul.f32 %v4934_v57, %v2482_v41 }
 0xab6   :  { %v2501_v47 = vmul.f32 %v4934_v57, %v2483_v62  ;;  %v2502_v4 = vmul.f32 %v4934_v57, %v2484_v42  ;;  %v2503_v40 = vmul.f32 %v4934_v57, %v2485_v49  ;;  %v2504_v30 = vmul.f32 %v4934_v57, %v2486_v10 }
 0xab7   :  { %v2535_v6 = vmul.f32 %v4939_v21, %v2511_v1  ;;  %v2522_v39 = vmul.f32 %v4939_v21, %v2498_v61  ;;  %v2523_v8 = vmul.f32 %v4939_v21, %v2499_v53  ;;  %v2524_v13 = vmul.f32 %v4939_v21, %v2500_v63 }
 0xab8   :  { %v2525_v54 = vmul.f32 %v4939_v21, %v2501_v47  ;;  %v2526_v59 = vmul.f32 %v4939_v21, %v2502_v4  ;;  %v2527_v17 = vmul.f32 %v4939_v21, %v2503_v40  ;;  %v2505_v33 = vmul.f32 %v4934_v57, %v2487_v56 }
 0xab9   :  { %v2546_v19 = vadd.f32 %v4948_v3, %v2522_v39  ;;  %v2547_v26 = vadd.f32 %v4948_v3, %v2523_v8  ;;  %v2548_v35 = vadd.f32 %v4948_v3, %v2524_v13  ;;  %v2528_v50 = vmul.f32 %v4939_v21, %v2504_v30 }
 0xaba   :  { %v2549_v58 = vadd.f32 %v4948_v3, %v2525_v54  ;;  %v2550_v14 = vadd.f32 %v4948_v3, %v2526_v59  ;;  %v2551_v60 = vadd.f32 %v4948_v3, %v2527_v17  ;;  %v2529_v31 = vmul.f32 %v4939_v21, %v2505_v33 }
 0xabb   :  { %v2562_v12 = vmax.f32 %v2546_v19, 0.0  ;;  %v2563_v48 = vmax.f32 %v2547_v26, 0.0  ;;  %v2564_v51 = vmax.f32 %v2548_v35, 0.0  ;;  %v2552_v38 = vadd.f32 %v4948_v3, %v2528_v50 }
 0xabc   :  { %v2565_v0 = vmax.f32 %v2549_v58, 0.0  ;;  %v2566_v2 = vmax.f32 %v2550_v14, 0.0  ;;  %v2567_v16 = vmax.f32 %v2551_v60, 0.0  ;;  %v2553_v46 = vadd.f32 %v4948_v3, %v2529_v31 }
 0xabd   :  { %v3496_v43 = vpack.c.bf16 %v2563_v48, %v2562_v12  ;;  %v2580_v29 = vmul.f32 0.0, %v2564_v51  ;;  %v2568_v36 = vmax.f32 %v2552_v38, 0.0  ;;  %v2506_v23 = vmul.f32 %v4934_v57, %v2488_v7  ;;  %v2910_v51 = vld [vmem:[%s5024_s8] ss:$0 sm:$0xff] }
 0xabe   :  { %v2581_v15 = vmul.f32 0.0, %v2565_v0  ;;  %v2582_v37 = vmul.f32 0.0, %v2566_v2  ;;  %v2583_v11 = vmul.f32 0.0, %v2567_v16  ;;  %v2569_v52 = vmax.f32 %v2553_v46, 0.0 }
 0xabf   :  { %3497 = vmatpush3.bf16.msra.mxu0 %v3496_v43  ;;  %v2584_v34 = vmul.f32 0.0, %v2568_v36  ;;  %v2507_v41 = vmul.f32 %v4934_v57, %v2489_v27  ;;  %v2530_v62 = vmul.f32 %v4939_v21, %v2506_v23  ;;  %v2508_v42 = vmul.f32 %v4934_v57, %v2490_v32 }
 0xac0   :  { %3498 = vmatprep.subr.bf16.mxu0 %v3627_v20  ;;  %v3499_v18 = vpack.c.bf16 %v2581_v15, %v2580_v29  ;;  %v3502_v49 = vpack.c.bf16 %v2583_v11, %v2582_v37  ;;  %v2585_v10 = vmul.f32 0.0, %v2569_v52  ;;  %v2509_v56 = vmul.f32 %v4934_v57, %v2491_v22 }
 0xac1   :  { %v2531_v7 = vmul.f32 %v4939_v21, %v2507_v41  ;;  %v2554_v55 = vadd.f32 %v4948_v3, %v2530_v62  ;;  %v2532_v45 = vmul.f32 %v4939_v21, %v2508_v42  ;;  %v2510_v1 = vmul.f32 %v4934_v57, %v2492_v28 }
 0xac2   :  { %v3505_v27 = vpack.c.bf16 %v2585_v10, %v2584_v34  ;;  %v2533_v61 = vmul.f32 %v4939_v21, %v2509_v56  ;;  %v2559_v32 = vadd.f32 %v4948_v3, %v2535_v6  ;;  %v2512_v53 = vmul.f32 %v4934_v57, %v2494_v25 }
 0xac3   :  { %3500 = vmatpush3.bf16.msra.mxu0 %v3499_v18  ;;  %v2555_v22 = vadd.f32 %v4948_v3, %v2531_v7  ;;  %v2570_v63 = vmax.f32 %v2554_v55, 0.0  ;;  %v2556_v47 = vadd.f32 %v4948_v3, %v2532_v45  ;;  %v2534_v4 = vmul.f32 %v4939_v21, %v2510_v1 }
 0xac4   :  { %3501 = vmatprep.subr.bf16.mxu0 %v3627_v20  ;;  %v2557_v28 = vadd.f32 %v4948_v3, %v2533_v61  ;;  %v2575_v40 = vmax.f32 %v2559_v32, 0.0  ;;  %v2513_v5 = vmul.f32 %v4934_v57, %v2495_v9  ;;  %v2536_v25 = vmul.f32 %v4939_v21, %v2512_v53 }
 0xac5   :  { %v2571_v30 = vmax.f32 %v2555_v22, 0.0  ;;  %v2586_v6 = vmul.f32 0.0, %v2570_v63  ;;  %v2572_v39 = vmax.f32 %v2556_v47, 0.0  ;;  %v2558_v8 = vadd.f32 %v4948_v3, %v2534_v4 }
 0xac6   :  { %v2573_v13 = vmax.f32 %v2557_v28, 0.0  ;;  %v2537_v54 = vmul.f32 %v4939_v21, %v2513_v5  ;;  %v2560_v59 = vadd.f32 %v4948_v3, %v2536_v25  ;;  %v2591_v26 = vmul.f32 0.0, %v2575_v40 }
 0xac7   :  { %3503 = vmatpush3.bf16.msra.mxu0 %v3502_v49  ;;  %v2587_v17 = vmul.f32 0.0, %v2571_v30  ;;  %v2588_v33 = vmul.f32 0.0, %v2572_v39  ;;  %v2574_v19 = vmax.f32 %v2558_v8, 0.0 }
 0xac8   :  { %3504 = vmatprep.subr.bf16.mxu0 %v3627_v20  ;;  %v2589_v24 = vmul.f32 0.0, %v2573_v13  ;;  %v2561_v44 = vadd.f32 %v4948_v3, %v2537_v54  ;;  %v2576_v9 = vmax.f32 %v2560_v59, 0.0  ;;  %v2594_v3 = vld [vmem:[%s5023_s6] sm:$0xff] }
 0xac9   :  { %v3508_v57 = vpack.c.bf16 %v2587_v17, %v2586_v6  ;;  %v2590_v35 = vmul.f32 0.0, %v2574_v19 }
 0xaca   :  { %v3511_v50 = vpack.c.bf16 %v2589_v24, %v2588_v33  ;;  %v2577_v58 = vmax.f32 %v2561_v44, 0.0  ;;  %v2592_v14 = vmul.f32 0.0, %v2576_v9 }
 0xacb   :  { %3506 = vmatpush3.bf16.msra.mxu0 %v3505_v27  ;;  %v3514_v21 = vpack.c.bf16 %v2591_v26, %v2590_v35 }
 0xacc   :  { %3507 = vmatprep.subr.bf16.mxu0 %v3627_v20  ;;  %v2593_v60 = vmul.f32 0.0, %v2577_v58 }
 0xace   :  { %v3517_v31 = vpack.c.bf16 %v2593_v60, %v2592_v14 }
 0xacf   :  { %3509 = vmatpush3.bf16.msra.mxu0 %v3508_v57 }
 0xad0   :  { %3510 = vmatprep.subr.bf16.mxu0 %v3627_v20 }
 0xad3   :  { %3512 = vmatpush3.bf16.msra.mxu0 %v3511_v50 }
 0xad4   :  { %3513 = vmatprep.subr.bf16.mxu0 %v3627_v20 }
 0xad7   :  { %3515 = vmatpush3.bf16.msra.mxu0 %v3514_v21 }
 0xad8   :  { %3516 = vmatprep.subr.bf16.mxu0 %v3627_v20 }
 0xadb   :  { %3518 = vmatpush3.bf16.msra.mxu0 %v3517_v31 }
 0xade   :  { %3458 = vmatmul.mubr.f32.vlgmr.msra.gmra.mrb[80].mxu0 %v2594_v3 }
 0xbb1   :  { %v2661_v12 = vpop.f32.mrb[80].mxu0 }
 0xbb2   :  { %v3459_v48 = vpop.f32.mrb[81].mxu0  ;;  %3493 = vmatmul.mubr.f32.vlgmr.msra.gmra.mrb[80].mxu1 %v2661_v12 }
 0xc85   :  { %v2754_v38 = vpop.f32.mrb[80].mxu1 }
 0xc86   :  { %v2755_v0 = vadd.f32 %v2910_v51, %v2754_v38  ;;  %v3494_v2 = vpop.f32.mrb[81].mxu1 }
 0xc88   :  { %2758 = vst [vmem:[%s5025_s9] sm:$0xff] %v2755_v0 }

</bundles_post_ra>
